<compile_context>
chip_gen: v6e
topology: v6e:2x2x1
jax: 0.10.0
libtpu: 0.0.40
codegen_flags: <defaults>
</compile_context>

<pallas_src>
import math

import numpy as np
import jax
import jax.numpy as jnp
from jax.experimental import pallas as pl
from jax.experimental.pallas import tpu as pltpu


_HIGHEST = jax.lax.Precision.HIGHEST      # used only by the pure-JAX reference
_INV_SQRT2 = 0.7071067811865476
_BN_EPS = 1e-5
_ROW_TILE = 512                            # row-strip preference (matmul LHS/out)
_COL_TILE = 512                            # output-column tile preference
_VMEM_LIMIT = 64 * 1024 * 1024


def _dim_tile(dim, pref):
    """Full dim if it fits, else `pref` (mult. of 8/128); ragged edge handled by cdiv grid."""
    return dim if dim <= pref else pref


def _conv_batch_block(B, per_img_bytes, n_cblk, budget=1 << 20):
    """Images per K2 grid step: big enough to amortize per-step overhead, but keep
    >= 2 parallel grid steps for dual-core chips when there is only one C block."""
    bb = 1
    for cand in range(1, B + 1):
        if B % cand == 0 and cand * per_img_bytes <= budget:
            bb = cand
    if n_cblk == 1 and B > 1:
        cap = max(B // 2, 1)
        while B % cap:
            cap -= 1
        bb = min(bb, cap)
    return bb


# ---------------------------------------------------------------------------
# Kernel 1: fc1  --  out = x @ w + b   ((M,N)-tiled, bf16 MXU, bf16 writeback)
# ---------------------------------------------------------------------------
def _linear_kernel(x_ref, w_ref, b_ref, o_ref):
    x = x_ref[...].astype(jnp.bfloat16)                       # cast in-kernel (no extra HBM pass)
    acc = jnp.dot(x, w_ref[...], preferred_element_type=jnp.float32)
    o_ref[...] = (acc + b_ref[...]).astype(o_ref.dtype)


def _linear(x2d, w_bf16, b, out_dtype):
    m, k = x2d.shape
    _, n = w_bf16.shape
    tm = _dim_tile(m, _ROW_TILE)
    tn = _dim_tile(n, _COL_TILE)
    return pl.pallas_call(
        _linear_kernel,
        out_shape=jax.ShapeDtypeStruct((m, n), out_dtype),
        grid=(pl.cdiv(m, tm), pl.cdiv(n, tn)),
        in_specs=[
            pl.BlockSpec((tm, k), lambda i, j: (i, 0)),
            pl.BlockSpec((k, tn), lambda i, j: (0, j)),
            pl.BlockSpec((1, tn), lambda i, j: (0, j)),
        ],
        out_specs=pl.BlockSpec((tm, tn), lambda i, j: (i, j)),
        compiler_params=pltpu.CompilerParams(
            dimension_semantics=("parallel", "parallel"),
            vmem_limit_bytes=_VMEM_LIMIT),
        cost_estimate=pl.CostEstimate(
            flops=2 * m * k * n,
            transcendentals=0,
            bytes_accessed=m * k * x2d.dtype.itemsize + 2 * k * n + 4 * n
                           + m * n * np.dtype(out_dtype).itemsize),
    )(x2d, w_bf16, b.reshape(1, n))


# ---------------------------------------------------------------------------
# Kernel 2: depthwise 3x3 conv (padding fused in-kernel) + per-group BN stats
# ---------------------------------------------------------------------------
def _dwconv_stats_kernel(x_ref, w_ref, conv_ref, stats_ref, xpad_ref):
    bb, H, W, _ = conv_ref.shape
    Hp, Wp, cblk = xpad_ref.shape                              # H+2, W+2, cblk

    # Re-zero only the 1-pixel halo border each step (cheap, O(H+W)); the interior
    # is fully overwritten per image, so the conv's zero padding is fused in-kernel.
    zrow = jnp.zeros((1, Wp, cblk), jnp.float32)
    zcol = jnp.zeros((Hp, 1, cblk), jnp.float32)
    xpad_ref[0:1, :, :] = zrow
    xpad_ref[H + 1:H + 2, :, :] = zrow
    xpad_ref[:, 0:1, :] = zcol
    xpad_ref[:, W + 1:W + 2, :] = zcol

    s1 = None
    s2 = None
    for ib in range(bb):                                       # static loop over the batch group
        # Stage the (H, W, cblk) image into the interior of the padded scratch.
        xpad_ref[1:H + 1, 1:W + 1, :] = x_ref[ib].astype(jnp.float32)

        # 3x3 depthwise conv = 9 shifted MACs; channels stay on the lane axis,
        # all math in f32 (v5e-safe).
        acc = xpad_ref[0:H, 0:W, :] * w_ref[0, 0:1, :]
        for kh in range(3):
            for kw in range(3):
                if kh == 0 and kw == 0:
                    continue
                acc = acc + xpad_ref[kh:kh + H, kw:kw + W, :] * w_ref[kh, kw:kw + 1, :]

        # Depthwise-conv bias intentionally dropped: a per-channel constant added
        # before train-mode BatchNorm is exactly cancelled by the mean subtraction.
        conv_ref[ib] = acc.astype(conv_ref.dtype)

        ps = jnp.sum(acc, axis=(0, 1), keepdims=True)[0]        # (1, cblk)
        pq = jnp.sum(acc * acc, axis=(0, 1), keepdims=True)[0]
        s1 = ps if s1 is None else s1 + ps
        s2 = pq if s2 is None else s2 + pq

    stats_ref[0:1, :] = s1                                      # per-group partial sums
    stats_ref[1:2, :] = s2


def _dwconv_stats(x_nhwc, w_dw, out_dtype):
    B, H, W, C = x_nhwc.shape
    cblk = 128 if (C > 128 and C % 128 == 0) else C
    n_cblk = C // cblk
    bb = _conv_batch_block(B, H * W * cblk * x_nhwc.dtype.itemsize, n_cblk)
    G = B // bb
    return pl.pallas_call(
        _dwconv_stats_kernel,
        out_shape=(jax.ShapeDtypeStruct((B, H, W, C), out_dtype),
                   jax.ShapeDtypeStruct((G, 2, C), jnp.float32)),
        grid=(n_cblk, G),
        in_specs=[
            pl.BlockSpec((bb, H, W, cblk), lambda ci, g: (g, 0, 0, ci)),
            pl.BlockSpec((3, 3, cblk), lambda ci, g: (0, 0, ci)),
        ],
        out_specs=(
            pl.BlockSpec((bb, H, W, cblk), lambda ci, g: (g, 0, 0, ci)),
            pl.BlockSpec((None, 2, cblk), lambda ci, g: (g, 0, ci)),
        ),
        scratch_shapes=[pltpu.VMEM((H + 2, W + 2, cblk), jnp.float32)],
        compiler_params=pltpu.CompilerParams(
            dimension_semantics=("parallel", "parallel"),
            vmem_limit_bytes=_VMEM_LIMIT),
        cost_estimate=pl.CostEstimate(
            flops=22 * B * H * W * C,
            transcendentals=0,
            bytes_accessed=B * H * W * C * x_nhwc.dtype.itemsize
                           + B * H * W * C * np.dtype(out_dtype).itemsize
                           + 4 * (9 * C + 2 * G * C)),
    )(x_nhwc, w_dw)


# ---------------------------------------------------------------------------
# Kernel 3: fused BatchNorm-normalize + GELU + fc2 ((M,N)-tiled, LHS cached)
# ---------------------------------------------------------------------------
def _erf_approx(x):
    # Abramowitz & Stegun 7.1.26 polynomial (max abs error ~1.5e-7).  The divide is
    # an approximate EUP reciprocal (free slot); remaining ops are abs/exp/mul/add/where.
    ax = jnp.abs(x)
    t = pl.reciprocal(1.0 + 0.3275911 * ax, approx=True)
    poly = t * (0.254829592 + t * (-0.284496736 + t * (1.421413741
             + t * (-1.453152027 + t * 1.061405429))))
    e = 1.0 - poly * jnp.exp(-ax * ax)
    return jnp.where(x >= 0, e, -e)


def _bn_gelu_linear_kernel(x_ref, scale_ref, shift_ref, w_ref, b_ref, o_ref, lhs_ref):
    # Compute the BN-normalized + GELU'd LHS row strip once (first column tile)
    # and reuse the bf16 VMEM copy for every output-column tile.
    @pl.when(pl.program_id(1) == 0)
    def _():
        xn = x_ref[...].astype(jnp.float32) * scale_ref[...] + shift_ref[...]
        g = 0.5 * xn * (1.0 + _erf_approx(xn * _INV_SQRT2))     # exact-form GELU (erf)
        lhs_ref[...] = g.astype(jnp.bfloat16)                   # dropout(p=0) = identity

    acc = jnp.dot(lhs_ref[...], w_ref[...], preferred_element_type=jnp.float32)
    o_ref[...] = (acc + b_ref[...]).astype(o_ref.dtype)


def _bn_gelu_linear(x2d, scale, shift, w_bf16, b):
    m, c = x2d.shape
    _, n = w_bf16.shape
    tm = _dim_tile(m, _ROW_TILE)
    tn = _dim_tile(n, _COL_TILE)
    return pl.pallas_call(
        _bn_gelu_linear_kernel,
        out_shape=jax.ShapeDtypeStruct((m, n), jnp.float32),
        grid=(pl.cdiv(m, tm), pl.cdiv(n, tn)),
        in_specs=[
            pl.BlockSpec((tm, c), lambda i, j: (i, 0)),
            pl.BlockSpec((1, c), lambda i, j: (0, 0)),
            pl.BlockSpec((1, c), lambda i, j: (0, 0)),
            pl.BlockSpec((c, tn), lambda i, j: (0, j)),
            pl.BlockSpec((1, tn), lambda i, j: (0, j)),
        ],
        out_specs=pl.BlockSpec((tm, tn), lambda i, j: (i, j)),
        scratch_shapes=[pltpu.VMEM((tm, c), jnp.bfloat16)],
        compiler_params=pltpu.CompilerParams(
            dimension_semantics=("parallel", "arbitrary"),
            vmem_limit_bytes=_VMEM_LIMIT),
        cost_estimate=pl.CostEstimate(
            flops=2 * m * c * n + 25 * m * c,
            transcendentals=2 * m * c,
            bytes_accessed=m * c * x2d.dtype.itemsize + 2 * c * n
                           + 4 * (m * n + 2 * c + n)),
    )(x2d, scale.reshape(1, c), shift.reshape(1, c), w_bf16, b.reshape(1, n))


# ---------------------------------------------------------------------------
# Full _MLP forward
# ---------------------------------------------------------------------------
def mlp_forward(x, params, inter_dtype=jnp.bfloat16):
    """Forward pass of `_MLP`.  x: (B, N, C) with N a perfect square -> (B, N, C).

    Weights are stored transposed w.r.t. PyTorch (`w = weight.T`, i.e.
    (in_features, out_features)); the depthwise kernel is stored as (3, 3, C).
    """
    B, N, C = x.shape
    H = W = int(math.sqrt(N))

    # bf16 weights for single-pass MXU matmuls (tiny one-time casts).
    w1 = params["w1"].astype(jnp.bfloat16)
    w2 = params["w2"].astype(jnp.bfloat16)

    # fc1 (bf16 intermediate writeback)
    y1 = _linear(x.reshape(B * N, C), w1, params["b1"], out_dtype=inter_dtype)

    # PyTorch's reshape(B,C,H,W) of the (B,N,C) tensor is a free flat reinterpretation;
    # the one real re-layout (NCHW -> NHWC for a lane-dense, fc2-ready conv) is done
    # here in bf16 so it costs half the HBM bytes of the f32 version.
    # TODO(synk): fold this transpose into K2 via in-kernel tile transposes.
    x_conv = jnp.transpose(y1.reshape(B, C, H, W), (0, 2, 3, 1))          # (B,H,W,C)

    # DWConv phase 1: conv + per-batch-group partial sum / sum-of-squares.
    conv, stats = _dwconv_stats(x_conv, params["w_dw"], out_dtype=inter_dtype)

    # Finalize train-mode BatchNorm statistics (tiny (G,2,C)-sized math).
    stats = jnp.sum(stats, axis=0)                                        # (2, C)
    cnt = float(B * H * W)
    mean = stats[0] / cnt
    var = jnp.maximum(stats[1] / cnt - mean * mean, 0.0)
    inv = jax.lax.rsqrt(var + _BN_EPS)
    scale = params["gamma"] * inv
    shift = params["beta"] - mean * scale

    # Phase 2 fused with fc2: normalize + GELU on the LHS strip inside the matmul.
    y2 = _bn_gelu_linear(conv.reshape(B * H * W, C), scale, shift,
                         w2, params["b2"])                                # (B*H*W, C)
    return y2.reshape(B, N, C)


# ---------------------------------------------------------------------------
# Pure-JAX reference (exact module semantics: train-mode BN, exact erf GELU)
# ---------------------------------------------------------------------------
def ref_forward(x, *, w1, b1, w_dw, b_dw, gamma, beta, w2, b2, H, W):
    B, N, C = x.shape
    y = jnp.dot(x, w1, precision=_HIGHEST) + b1                           # fc1
    y = y.reshape(B, C, H, W)                                             # torch reshape
    k = jnp.transpose(w_dw, (2, 0, 1))[:, None, :, :]                     # (C,1,3,3)
    y = jax.lax.conv_general_dilated(
        y, k, window_strides=(1, 1), padding=((1, 1), (1, 1)),
        feature_group_count=C,
        dimension_numbers=("NCHW", "OIHW", "NCHW"),
        precision=_HIGHEST)
    y = y + b_dw[None, :, None, None]                                     # conv bias
    mean = jnp.mean(y, axis=(0, 2, 3), keepdims=True)                     # train-mode BN
    var = jnp.mean((y - mean) ** 2, axis=(0, 2, 3), keepdims=True)
    y = (y - mean) * jax.lax.rsqrt(var + _BN_EPS)
    y = y * gamma[None, :, None, None] + beta[None, :, None, None]
    y = y.reshape(B, C, H * W).transpose(0, 2, 1)                         # flatten/T
    y = 0.5 * y * (1.0 + jax.lax.erf(y * _INV_SQRT2))                     # exact GELU
    y = jnp.dot(y, w2, precision=_HIGHEST) + b2                           # fc2
    return y                                                              # dropout = id


if __name__ == "__main__":
    B, C, H, W = 2, 32, 8, 8          # in_feature = 32, N = 64 (small config)
    N = H * W

    key = jax.random.PRNGKey(0)
    ks = jax.random.split(key, 8)
    x = jax.random.normal(ks[0], (B, N, C), jnp.float32)
    params = dict(
        w1=0.2 * jax.random.normal(ks[1], (C, C), jnp.float32),      # fc1 weight.T
        b1=0.1 * jax.random.normal(ks[2], (C,), jnp.float32),
        w_dw=0.3 * jax.random.normal(ks[3], (3, 3, C), jnp.float32),  # depthwise (kh,kw,C)
        b_dw=0.1 * jax.random.normal(ks[4], (C,), jnp.float32),
        gamma=jnp.ones((C,), jnp.float32),                            # BN default affine
        beta=jnp.zeros((C,), jnp.float32),
        w2=0.2 * jax.random.normal(ks[5], (C, C), jnp.float32),       # fc2 weight.T
        b2=0.1 * jax.random.normal(ks[6], (C,), jnp.float32),
    )

    fwd = jax.jit(mlp_forward)
    out = jax.block_until_ready(fwd(x, params))

    ref = ref_forward(x, H=H, W=W, **params)
    assert out.shape == (B, N, C), out.shape
    err = float(jnp.max(jnp.abs(out - ref)))
    # bf16 MXU operands + bf16 intermediates => looser tolerance vs. the f32 reference.
    assert err < 4e-2, f"max abs err {err}"

    print("KERNEL_OK")
</pallas_src>

<mosaic_0001>
module attributes {stable_mosaic.version = 11 : i64} {
  func.func @_linear_kernel(%arg0: i32, %arg1: i32, %arg2: memref<128x32xf32, #tpu.memory_space<vmem>>, %arg3: memref<32x32xbf16, #tpu.memory_space<vmem>>, %arg4: memref<1x32xf32, #tpu.memory_space<vmem>>, %arg5: memref<128x32xbf16, #tpu.memory_space<vmem>>) attributes {dimension_semantics = [#tpu.dimension_semantics<parallel>, #tpu.dimension_semantics<parallel>], iteration_bounds = array<i64: 1, 1>, scalar_prefetch = 0 : i64, scratch_operands = 0 : i64, tpu.core_type = #tpu.core_type<tc>, window_params = [{transform_indices = @transform_0, window_bounds = array<i64: 128, 32>}, {transform_indices = @transform_1, window_bounds = array<i64: 32, 32>}, {transform_indices = @transform_2, window_bounds = array<i64: 1, 32>}, {transform_indices = @transform_3, window_bounds = array<i64: 128, 32>}]} {
    %c0 = arith.constant 0 : index
    %c0_0 = arith.constant 0 : index
    %0 = vector.load %arg2[%c0, %c0_0] : memref<128x32xf32, #tpu.memory_space<vmem>>, vector<128x32xf32>
    %1 = arith.truncf %0 : vector<128x32xf32> to vector<128x32xbf16>
    %c0_1 = arith.constant 0 : index
    %c0_2 = arith.constant 0 : index
    %2 = vector.load %arg3[%c0_1, %c0_2] : memref<32x32xbf16, #tpu.memory_space<vmem>>, vector<32x32xbf16>
    %cst = arith.constant dense<0.000000e+00> : vector<128x32xf32>
    %3 = tpu.matmul %1, %2, %cst {dimension_numbers = #tpu.dot_dimension_numbers<[1], [0], [0], [1], [0, 0, 1, 1], [], []>} : vector<128x32xbf16>, vector<32x32xbf16>, vector<128x32xf32> -> vector<128x32xf32>
    %c0_3 = arith.constant 0 : index
    %c0_4 = arith.constant 0 : index
    %4 = vector.load %arg4[%c0_3, %c0_4] : memref<1x32xf32, #tpu.memory_space<vmem>>, vector<1x32xf32>
    %5 = vector.broadcast %4 : vector<1x32xf32> to vector<128x32xf32>
    %6 = arith.addf %3, %5 : vector<128x32xf32>
    %7 = arith.truncf %6 : vector<128x32xf32> to vector<128x32xbf16>
    %c0_5 = arith.constant 0 : index
    %c0_6 = arith.constant 0 : index
    %8 = vector.load %arg5[%c0_5, %c0_6] : memref<128x32xbf16, #tpu.memory_space<vmem>>, vector<128x32xbf16>
    tpu.vector_store %arg5[%c0_5, %c0_6], %7 {strides = array<i32>} : memref<128x32xbf16, #tpu.memory_space<vmem>>, vector<128x32xbf16>,
    return
  }
  func.func @transform_0(%arg0: i32, %arg1: i32) -> (i32, i32) {
    %c0_i32 = arith.constant 0 : i32
    %c0_i32_0 = arith.constant 0 : i32
    return %arg0, %c0_i32 : i32, i32
  }
  func.func @transform_1(%arg0: i32, %arg1: i32) -> (i32, i32) {
    %c0_i32 = arith.constant 0 : i32
    %c0_i32_0 = arith.constant 0 : i32
    return %c0_i32, %arg1 : i32, i32
  }
  func.func @transform_2(%arg0: i32, %arg1: i32) -> (i32, i32) {
    %c0_i32 = arith.constant 0 : i32
    %c0_i32_0 = arith.constant 0 : i32
    return %c0_i32, %arg1 : i32, i32
  }
  func.func @transform_3(%arg0: i32, %arg1: i32) -> (i32, i32) {
    %c0_i32 = arith.constant 0 : i32
    return %arg0, %arg1 : i32, i32
  }
}

module attributes {stable_mosaic.version = 11 : i64} {
  func.func @_dwconv_stats_kernel(%arg0: i32, %arg1: i32, %arg2: memref<1x8x8x32xbf16, #tpu.memory_space<vmem>>, %arg3: memref<3x3x32xf32, #tpu.memory_space<vmem>>, %arg4: memref<1x8x8x32xbf16, #tpu.memory_space<vmem>>, %arg5: memref<1x2x32xf32, #tpu.memory_space<vmem>>, %arg6: memref<10x10x32xf32, #tpu.memory_space<vmem>>) attributes {dimension_semantics = [#tpu.dimension_semantics<parallel>, #tpu.dimension_semantics<parallel>], iteration_bounds = array<i64: 1, 2>, scalar_prefetch = 0 : i64, scratch_operands = 1 : i64, tpu.core_type = #tpu.core_type<tc>, window_params = [{transform_indices = @transform_0, window_bounds = array<i64: 1, 8, 8, 32>}, {transform_indices = @transform_1, window_bounds = array<i64: 3, 3, 32>}, {transform_indices = @transform_2, window_bounds = array<i64: 1, 8, 8, 32>}, {transform_indices = @transform_3, window_bounds = array<i64: 1, 2, 32>}]} {
    %cst = arith.constant 0.000000e+00 : f32
    %0 = vector.broadcast %cst : f32 to vector<1x10x32xf32>
    %cst_0 = arith.constant 0.000000e+00 : f32
    %1 = vector.broadcast %cst_0 : f32 to vector<10x1x32xf32>
    %c0 = arith.constant 0 : index
    %c0_1 = arith.constant 0 : index
    %c0_2 = arith.constant 0 : index
    %2 = vector.load %arg6[%c0, %c0_1, %c0_2] : memref<10x10x32xf32, #tpu.memory_space<vmem>>, vector<1x10x32xf32>
    tpu.vector_store %arg6[%c0, %c0_1, %c0_2], %0 {strides = array<i32>} : memref<10x10x32xf32, #tpu.memory_space<vmem>>, vector<1x10x32xf32>,
    %c9 = arith.constant 9 : index
    %c0_3 = arith.constant 0 : index
    %c0_4 = arith.constant 0 : index
    %3 = vector.load %arg6[%c9, %c0_3, %c0_4] : memref<10x10x32xf32, #tpu.memory_space<vmem>>, vector<1x10x32xf32>
    tpu.vector_store %arg6[%c9, %c0_3, %c0_4], %0 {strides = array<i32>} : memref<10x10x32xf32, #tpu.memory_space<vmem>>, vector<1x10x32xf32>,
    %c0_5 = arith.constant 0 : index
    %c0_6 = arith.constant 0 : index
    %c0_7 = arith.constant 0 : index
    %4 = vector.load %arg6[%c0_5, %c0_6, %c0_7] : memref<10x10x32xf32, #tpu.memory_space<vmem>>, vector<10x1x32xf32>
    tpu.vector_store %arg6[%c0_5, %c0_6, %c0_7], %1 {strides = array<i32>} : memref<10x10x32xf32, #tpu.memory_space<vmem>>, vector<10x1x32xf32>,
    %c0_8 = arith.constant 0 : index
    %c9_9 = arith.constant 9 : index
    %c0_10 = arith.constant 0 : index
    %5 = vector.load %arg6[%c0_8, %c9_9, %c0_10] : memref<10x10x32xf32, #tpu.memory_space<vmem>>, vector<10x1x32xf32>
    tpu.vector_store %arg6[%c0_8, %c9_9, %c0_10], %1 {strides = array<i32>} : memref<10x10x32xf32, #tpu.memory_space<vmem>>, vector<10x1x32xf32>,
    %c0_11 = arith.constant 0 : index
    %c0_12 = arith.constant 0 : index
    %c0_13 = arith.constant 0 : index
    %c0_14 = arith.constant 0 : index
    %6 = vector.load %arg2[%c0_11, %c0_12, %c0_13, %c0_14] : memref<1x8x8x32xbf16, #tpu.memory_space<vmem>>, vector<1x8x8x32xbf16>
    %7 = vector.shape_cast %6 : vector<1x8x8x32xbf16> to vector<8x8x32xbf16>
    %8 = arith.extf %7 : vector<8x8x32xbf16> to vector<8x8x32xf32>
    %c1 = arith.constant 1 : index
    %c1_15 = arith.constant 1 : index
    %c0_16 = arith.constant 0 : index
    %9 = vector.load %arg6[%c1, %c1_15, %c0_16] : memref<10x10x32xf32, #tpu.memory_space<vmem>>, vector<8x8x32xf32>
    tpu.vector_store %arg6[%c1, %c1_15, %c0_16], %8 {strides = array<i32>} : memref<10x10x32xf32, #tpu.memory_space<vmem>>, vector<8x8x32xf32>,
    %c0_17 = arith.constant 0 : index
    %c0_18 = arith.constant 0 : index
    %c0_19 = arith.constant 0 : index
    %10 = vector.load %arg6[%c0_17, %c0_18, %c0_19] : memref<10x10x32xf32, #tpu.memory_space<vmem>>, vector<8x8x32xf32>
    %c0_20 = arith.constant 0 : index
    %c0_21 = arith.constant 0 : index
    %c0_22 = arith.constant 0 : index
    %11 = vector.load %arg3[%c0_20, %c0_21, %c0_22] : memref<3x3x32xf32, #tpu.memory_space<vmem>>, vector<1x1x32xf32>
    %12 = vector.shape_cast %11 : vector<1x1x32xf32> to vector<1x32xf32>
    %13 = vector.shape_cast %12 : vector<1x32xf32> to vector<1x1x32xf32>
    %14 = vector.broadcast %13 : vector<1x1x32xf32> to vector<8x8x32xf32>
    %15 = arith.mulf %10, %14 : vector<8x8x32xf32>
    %c0_23 = arith.constant 0 : index
    %c1_24 = arith.constant 1 : index
    %c0_25 = arith.constant 0 : index
    %16 = vector.load %arg6[%c0_23, %c1_24, %c0_25] : memref<10x10x32xf32, #tpu.memory_space<vmem>>, vector<8x8x32xf32>
    %c0_26 = arith.constant 0 : index
    %c1_27 = arith.constant 1 : index
    %c0_28 = arith.constant 0 : index
    %17 = vector.load %arg3[%c0_26, %c1_27, %c0_28] : memref<3x3x32xf32, #tpu.memory_space<vmem>>, vector<1x1x32xf32>
    %18 = vector.shape_cast %17 : vector<1x1x32xf32> to vector<1x32xf32>
    %19 = vector.shape_cast %18 : vector<1x32xf32> to vector<1x1x32xf32>
    %20 = vector.broadcast %19 : vector<1x1x32xf32> to vector<8x8x32xf32>
    %21 = arith.mulf %16, %20 : vector<8x8x32xf32>
    %22 = arith.addf %15, %21 : vector<8x8x32xf32>
    %c0_29 = arith.constant 0 : index
    %c2 = arith.constant 2 : index
    %c0_30 = arith.constant 0 : index
    %23 = vector.load %arg6[%c0_29, %c2, %c0_30] : memref<10x10x32xf32, #tpu.memory_space<vmem>>, vector<8x8x32xf32>
    %c0_31 = arith.constant 0 : index
    %c2_32 = arith.constant 2 : index
    %c0_33 = arith.constant 0 : index
    %24 = vector.load %arg3[%c0_31, %c2_32, %c0_33] : memref<3x3x32xf32, #tpu.memory_space<vmem>>, vector<1x1x32xf32>
    %25 = vector.shape_cast %24 : vector<1x1x32xf32> to vector<1x32xf32>
    %26 = vector.shape_cast %25 : vector<1x32xf32> to vector<1x1x32xf32>
    %27 = vector.broadcast %26 : vector<1x1x32xf32> to vector<8x8x32xf32>
    %28 = arith.mulf %23, %27 : vector<8x8x32xf32>
    %29 = arith.addf %22, %28 : vector<8x8x32xf32>
    %c1_34 = arith.constant 1 : index
    %c0_35 = arith.constant 0 : index
    %c0_36 = arith.constant 0 : index
    %30 = vector.load %arg6[%c1_34, %c0_35, %c0_36] : memref<10x10x32xf32, #tpu.memory_space<vmem>>, vector<8x8x32xf32>
    %c1_37 = arith.constant 1 : index
    %c0_38 = arith.constant 0 : index
    %c0_39 = arith.constant 0 : index
    %31 = vector.load %arg3[%c1_37, %c0_38, %c0_39] : memref<3x3x32xf32, #tpu.memory_space<vmem>>, vector<1x1x32xf32>
    %32 = vector.shape_cast %31 : vector<1x1x32xf32> to vector<1x32xf32>
    %33 = vector.shape_cast %32 : vector<1x32xf32> to vector<1x1x32xf32>
    %34 = vector.broadcast %33 : vector<1x1x32xf32> to vector<8x8x32xf32>
    %35 = arith.mulf %30, %34 : vector<8x8x32xf32>
    %36 = arith.addf %29, %35 : vector<8x8x32xf32>
    %c1_40 = arith.constant 1 : index
    %c1_41 = arith.constant 1 : index
    %c0_42 = arith.constant 0 : index
    %37 = vector.load %arg6[%c1_40, %c1_41, %c0_42] : memref<10x10x32xf32, #tpu.memory_space<vmem>>, vector<8x8x32xf32>
    %c1_43 = arith.constant 1 : index
    %c1_44 = arith.constant 1 : index
    %c0_45 = arith.constant 0 : index
    %38 = vector.load %arg3[%c1_43, %c1_44, %c0_45] : memref<3x3x32xf32, #tpu.memory_space<vmem>>, vector<1x1x32xf32>
    %39 = vector.shape_cast %38 : vector<1x1x32xf32> to vector<1x32xf32>
    %40 = vector.shape_cast %39 : vector<1x32xf32> to vector<1x1x32xf32>
    %41 = vector.broadcast %40 : vector<1x1x32xf32> to vector<8x8x32xf32>
    %42 = arith.mulf %37, %41 : vector<8x8x32xf32>
    %43 = arith.addf %36, %42 : vector<8x8x32xf32>
    %c1_46 = arith.constant 1 : index
    %c2_47 = arith.constant 2 : index
    %c0_48 = arith.constant 0 : index
    %44 = vector.load %arg6[%c1_46, %c2_47, %c0_48] : memref<10x10x32xf32, #tpu.memory_space<vmem>>, vector<8x8x32xf32>
    %c1_49 = arith.constant 1 : index
    %c2_50 = arith.constant 2 : index
    %c0_51 = arith.constant 0 : index
    %45 = vector.load %arg3[%c1_49, %c2_50, %c0_51] : memref<3x3x32xf32, #tpu.memory_space<vmem>>, vector<1x1x32xf32>
    %46 = vector.shape_cast %45 : vector<1x1x32xf32> to vector<1x32xf32>
    %47 = vector.shape_cast %46 : vector<1x32xf32> to vector<1x1x32xf32>
    %48 = vector.broadcast %47 : vector<1x1x32xf32> to vector<8x8x32xf32>
    %49 = arith.mulf %44, %48 : vector<8x8x32xf32>
    %50 = arith.addf %43, %49 : vector<8x8x32xf32>
    %c2_52 = arith.constant 2 : index
    %c0_53 = arith.constant 0 : index
    %c0_54 = arith.constant 0 : index
    %51 = vector.load %arg6[%c2_52, %c0_53, %c0_54] : memref<10x10x32xf32, #tpu.memory_space<vmem>>, vector<8x8x32xf32>
    %c2_55 = arith.constant 2 : index
    %c0_56 = arith.constant 0 : index
    %c0_57 = arith.constant 0 : index
    %52 = vector.load %arg3[%c2_55, %c0_56, %c0_57] : memref<3x3x32xf32, #tpu.memory_space<vmem>>, vector<1x1x32xf32>
    %53 = vector.shape_cast %52 : vector<1x1x32xf32> to vector<1x32xf32>
    %54 = vector.shape_cast %53 : vector<1x32xf32> to vector<1x1x32xf32>
    %55 = vector.broadcast %54 : vector<1x1x32xf32> to vector<8x8x32xf32>
    %56 = arith.mulf %51, %55 : vector<8x8x32xf32>
    %57 = arith.addf %50, %56 : vector<8x8x32xf32>
    %c2_58 = arith.constant 2 : index
    %c1_59 = arith.constant 1 : index
    %c0_60 = arith.constant 0 : index
    %58 = vector.load %arg6[%c2_58, %c1_59, %c0_60] : memref<10x10x32xf32, #tpu.memory_space<vmem>>, vector<8x8x32xf32>
    %c2_61 = arith.constant 2 : index
    %c1_62 = arith.constant 1 : index
    %c0_63 = arith.constant 0 : index
    %59 = vector.load %arg3[%c2_61, %c1_62, %c0_63] : memref<3x3x32xf32, #tpu.memory_space<vmem>>, vector<1x1x32xf32>
    %60 = vector.shape_cast %59 : vector<1x1x32xf32> to vector<1x32xf32>
    %61 = vector.shape_cast %60 : vector<1x32xf32> to vector<1x1x32xf32>
    %62 = vector.broadcast %61 : vector<1x1x32xf32> to vector<8x8x32xf32>
    %63 = arith.mulf %58, %62 : vector<8x8x32xf32>
    %64 = arith.addf %57, %63 : vector<8x8x32xf32>
    %c2_64 = arith.constant 2 : index
    %c2_65 = arith.constant 2 : index
    %c0_66 = arith.constant 0 : index
    %65 = vector.load %arg6[%c2_64, %c2_65, %c0_66] : memref<10x10x32xf32, #tpu.memory_space<vmem>>, vector<8x8x32xf32>
    %c2_67 = arith.constant 2 : index
    %c2_68 = arith.constant 2 : index
    %c0_69 = arith.constant 0 : index
    %66 = vector.load %arg3[%c2_67, %c2_68, %c0_69] : memref<3x3x32xf32, #tpu.memory_space<vmem>>, vector<1x1x32xf32>
    %67 = vector.shape_cast %66 : vector<1x1x32xf32> to vector<1x32xf32>
    %68 = vector.shape_cast %67 : vector<1x32xf32> to vector<1x1x32xf32>
    %69 = vector.broadcast %68 : vector<1x1x32xf32> to vector<8x8x32xf32>
    %70 = arith.mulf %65, %69 : vector<8x8x32xf32>
    %71 = arith.addf %64, %70 : vector<8x8x32xf32>
    %72 = arith.truncf %71 : vector<8x8x32xf32> to vector<8x8x32xbf16>
    %c0_70 = arith.constant 0 : index
    %c0_71 = arith.constant 0 : index
    %c0_72 = arith.constant 0 : index
    %c0_73 = arith.constant 0 : index
    %73 = vector.load %arg4[%c0_70, %c0_71, %c0_72, %c0_73] : memref<1x8x8x32xbf16, #tpu.memory_space<vmem>>, vector<1x8x8x32xbf16>
    %74 = vector.shape_cast %73 : vector<1x8x8x32xbf16> to vector<8x8x32xbf16>
    %75 = vector.shape_cast %72 : vector<8x8x32xbf16> to vector<1x8x8x32xbf16>
    tpu.vector_store %arg4[%c0_70, %c0_71, %c0_72, %c0_73], %75 {strides = array<i32>} : memref<1x8x8x32xbf16, #tpu.memory_space<vmem>>, vector<1x8x8x32xbf16>,
    %cst_74 = arith.constant dense<0.000000e+00> : vector<32xf32>
    %76 = vector.multi_reduction <add>, %71, %cst_74 [0, 1] : vector<8x8x32xf32> to vector<32xf32>
    %77 = vector.shape_cast %76 : vector<32xf32> to vector<1x1x32xf32>
    %78 = vector.shape_cast %77 : vector<1x1x32xf32> to vector<1x32xf32>
    %79 = arith.mulf %71, %71 : vector<8x8x32xf32>
    %cst_75 = arith.constant dense<0.000000e+00> : vector<32xf32>
    %80 = vector.multi_reduction <add>, %79, %cst_75 [0, 1] : vector<8x8x32xf32> to vector<32xf32>
    %81 = vector.shape_cast %80 : vector<32xf32> to vector<1x1x32xf32>
    %82 = vector.shape_cast %81 : vector<1x1x32xf32> to vector<1x32xf32>
    %c0_76 = arith.constant 0 : index
    %c0_77 = arith.constant 0 : index
    %c0_78 = arith.constant 0 : index
    %83 = vector.load %arg5[%c0_76, %c0_77, %c0_78] : memref<1x2x32xf32, #tpu.memory_space<vmem>>, vector<1x1x32xf32>
    %84 = vector.shape_cast %83 : vector<1x1x32xf32> to vector<1x32xf32>
    %85 = vector.shape_cast %78 : vector<1x32xf32> to vector<1x1x32xf32>
    tpu.vector_store %arg5[%c0_76, %c0_77, %c0_78], %85 {strides = array<i32>} : memref<1x2x32xf32, #tpu.memory_space<vmem>>, vector<1x1x32xf32>,
    %c0_79 = arith.constant 0 : index
    %c1_80 = arith.constant 1 : index
    %c0_81 = arith.constant 0 : index
    %86 = vector.load %arg5[%c0_79, %c1_80, %c0_81] : memref<1x2x32xf32, #tpu.memory_space<vmem>>, vector<1x1x32xf32>
    %87 = vector.shape_cast %86 : vector<1x1x32xf32> to vector<1x32xf32>
    %88 = vector.shape_cast %82 : vector<1x32xf32> to vector<1x1x32xf32>
    tpu.vector_store %arg5[%c0_79, %c1_80, %c0_81], %88 {strides = array<i32>} : memref<1x2x32xf32, #tpu.memory_space<vmem>>, vector<1x1x32xf32>,
    return
  }
  func.func @transform_0(%arg0: i32, %arg1: i32) -> (i32, i32, i32, i32) {
    %c0_i32 = arith.constant 0 : i32
    %c0_i32_0 = arith.constant 0 : i32
    %c0_i32_1 = arith.constant 0 : i32
    return %arg1, %c0_i32, %c0_i32_0, %arg0 : i32, i32, i32, i32
  }
  func.func @transform_1(%arg0: i32, %arg1: i32) -> (i32, i32, i32) {
    %c0_i32 = arith.constant 0 : i32
    %c0_i32_0 = arith.constant 0 : i32
    %c0_i32_1 = arith.constant 0 : i32
    return %c0_i32, %c0_i32_0, %arg0 : i32, i32, i32
  }
  func.func @transform_2(%arg0: i32, %arg1: i32) -> (i32, i32, i32, i32) {
    %c0_i32 = arith.constant 0 : i32
    %c0_i32_0 = arith.constant 0 : i32
    %c0_i32_1 = arith.constant 0 : i32
    return %arg1, %c0_i32, %c0_i32_0, %arg0 : i32, i32, i32, i32
  }
  func.func @transform_3(%arg0: i32, %arg1: i32) -> (i32, i32, i32) {
    %c0_i32 = arith.constant 0 : i32
    %c0_i32_0 = arith.constant 0 : i32
    return %arg1, %c0_i32, %arg0 : i32, i32, i32
  }
}

module attributes {stable_mosaic.version = 11 : i64} {
  func.func @_bn_gelu_linear_kernel(%arg0: i32, %arg1: i32, %arg2: memref<128x32xbf16, #tpu.memory_space<vmem>>, %arg3: memref<1x32xf32, #tpu.memory_space<vmem>>, %arg4: memref<1x32xf32, #tpu.memory_space<vmem>>, %arg5: memref<32x32xbf16, #tpu.memory_space<vmem>>, %arg6: memref<1x32xf32, #tpu.memory_space<vmem>>, %arg7: memref<128x32xf32, #tpu.memory_space<vmem>>, %arg8: memref<128x32xbf16, #tpu.memory_space<vmem>>) attributes {dimension_semantics = [#tpu.dimension_semantics<parallel>, #tpu.dimension_semantics<arbitrary>], iteration_bounds = array<i64: 1, 1>, scalar_prefetch = 0 : i64, scratch_operands = 1 : i64, tpu.core_type = #tpu.core_type<tc>, window_params = [{transform_indices = @transform_0, window_bounds = array<i64: 128, 32>}, {pipeline_mode = #tpu.pipeline_mode<synchronous>, transform_indices = @transform_1, window_bounds = array<i64: 1, 32>}, {pipeline_mode = #tpu.pipeline_mode<synchronous>, transform_indices = @transform_2, window_bounds = array<i64: 1, 32>}, {transform_indices = @transform_3, window_bounds = array<i64: 32, 32>}, {transform_indices = @transform_4, window_bounds = array<i64: 1, 32>}, {transform_indices = @transform_5, window_bounds = array<i64: 128, 32>}]} {
    %c0_i32 = arith.constant 0 : i32
    %0 = arith.cmpi eq, %arg1, %c0_i32 : i32
    %1 = arith.extui %0 : i1 to i32
    %c0_i32_0 = arith.constant 0 : i32
    %2 = arith.cmpi ne, %1, %c0_i32_0 : i32
    scf.if %2 {
      %c0_8 = arith.constant 0 : index
      %c0_9 = arith.constant 0 : index
      %10 = vector.load %arg2[%c0_8, %c0_9] : memref<128x32xbf16, #tpu.memory_space<vmem>>, vector<128x32xbf16>
      %11 = arith.extf %10 : vector<128x32xbf16> to vector<128x32xf32>
      %c0_10 = arith.constant 0 : index
      %c0_11 = arith.constant 0 : index
      %12 = vector.load %arg3[%c0_10, %c0_11] : memref<1x32xf32, #tpu.memory_space<vmem>>, vector<1x32xf32>
      %13 = vector.broadcast %12 : vector<1x32xf32> to vector<128x32xf32>
      %14 = arith.mulf %11, %13 : vector<128x32xf32>
      %c0_12 = arith.constant 0 : index
      %c0_13 = arith.constant 0 : index
      %15 = vector.load %arg4[%c0_12, %c0_13] : memref<1x32xf32, #tpu.memory_space<vmem>>, vector<1x32xf32>
      %16 = vector.broadcast %15 : vector<1x32xf32> to vector<128x32xf32>
      %17 = arith.addf %14, %16 : vector<128x32xf32>
      %cst_14 = arith.constant 5.000000e-01 : f32
      %18 = vector.broadcast %cst_14 : f32 to vector<128x32xf32>
      %19 = arith.mulf %18, %17 : vector<128x32xf32>
      %cst_15 = arith.constant 0.707106769 : f32
      %20 = vector.broadcast %cst_15 : f32 to vector<128x32xf32>
      %21 = arith.mulf %17, %20 : vector<128x32xf32>
      %22 = math.absf %21 : vector<128x32xf32>
      %cst_16 = arith.constant 0.327591091 : f32
      %23 = vector.broadcast %cst_16 : f32 to vector<128x32xf32>
      %24 = arith.mulf %23, %22 : vector<128x32xf32>
      %cst_17 = arith.constant 1.000000e+00 : f32
      %25 = vector.broadcast %cst_17 : f32 to vector<128x32xf32>
      %26 = arith.addf %25, %24 : vector<128x32xf32>
      %27 = tpu.reciprocal %26 {approx = true} : vector<128x32xf32> -> vector<128x32xf32>
      %cst_18 = arith.constant 1.06140542 : f32
      %28 = vector.broadcast %cst_18 : f32 to vector<128x32xf32>
      %29 = arith.mulf %27, %28 : vector<128x32xf32>
      %cst_19 = arith.constant -1.45315206 : f32
      %30 = vector.broadcast %cst_19 : f32 to vector<128x32xf32>
      %31 = arith.addf %30, %29 : vector<128x32xf32>
      %32 = arith.mulf %27, %31 : vector<128x32xf32>
      %cst_20 = arith.constant 1.42141378 : f32
      %33 = vector.broadcast %cst_20 : f32 to vector<128x32xf32>
      %34 = arith.addf %33, %32 : vector<128x32xf32>
      %35 = arith.mulf %27, %34 : vector<128x32xf32>
      %cst_21 = arith.constant -0.284496725 : f32
      %36 = vector.broadcast %cst_21 : f32 to vector<128x32xf32>
      %37 = arith.addf %36, %35 : vector<128x32xf32>
      %38 = arith.mulf %27, %37 : vector<128x32xf32>
      %cst_22 = arith.constant 0.254829586 : f32
      %39 = vector.broadcast %cst_22 : f32 to vector<128x32xf32>
      %40 = arith.addf %39, %38 : vector<128x32xf32>
      %41 = arith.mulf %27, %40 : vector<128x32xf32>
      %cst_23 = arith.constant 0.000000e+00 : f32
      %42 = vector.broadcast %cst_23 : f32 to vector<128x32xf32>
      %43 = arith.subf %42, %22 : vector<128x32xf32>
      %44 = arith.mulf %43, %22 : vector<128x32xf32>
      %45 = math.exp %44 : vector<128x32xf32>
      %46 = arith.mulf %41, %45 : vector<128x32xf32>
      %cst_24 = arith.constant 1.000000e+00 : f32
      %47 = vector.broadcast %cst_24 : f32 to vector<128x32xf32>
      %48 = arith.subf %47, %46 : vector<128x32xf32>
      %cst_25 = arith.constant 0.000000e+00 : f32
      %49 = vector.broadcast %cst_25 : f32 to vector<128x32xf32>
      %50 = arith.cmpf oge, %21, %49 : vector<128x32xf32>
      %cst_26 = arith.constant 0.000000e+00 : f32
      %51 = vector.broadcast %cst_26 : f32 to vector<128x32xf32>
      %52 = arith.subf %51, %48 : vector<128x32xf32>
      %53 = arith.select %50, %48, %52 : vector<128x32xi1>, vector<128x32xf32>
      %cst_27 = arith.constant 1.000000e+00 : f32
      %54 = vector.broadcast %cst_27 : f32 to vector<128x32xf32>
      %55 = arith.addf %54, %53 : vector<128x32xf32>
      %56 = arith.mulf %19, %55 : vector<128x32xf32>
      %57 = arith.truncf %56 : vector<128x32xf32> to vector<128x32xbf16>
      %c0_28 = arith.constant 0 : index
      %c0_29 = arith.constant 0 : index
      %58 = vector.load %arg8[%c0_28, %c0_29] : memref<128x32xbf16, #tpu.memory_space<vmem>>, vector<128x32xbf16>
      tpu.vector_store %arg8[%c0_28, %c0_29], %57 {strides = array<i32>} : memref<128x32xbf16, #tpu.memory_space<vmem>>, vector<128x32xbf16>,
    } else {
    }
    %c0 = arith.constant 0 : index
    %c0_1 = arith.constant 0 : index
    %3 = vector.load %arg8[%c0, %c0_1] : memref<128x32xbf16, #tpu.memory_space<vmem>>, vector<128x32xbf16>
    %c0_2 = arith.constant 0 : index
    %c0_3 = arith.constant 0 : index
    %4 = vector.load %arg5[%c0_2, %c0_3] : memref<32x32xbf16, #tpu.memory_space<vmem>>, vector<32x32xbf16>
    %cst = arith.constant dense<0.000000e+00> : vector<128x32xf32>
    %5 = tpu.matmul %3, %4, %cst {dimension_numbers = #tpu.dot_dimension_numbers<[1], [0], [0], [1], [0, 0, 1, 1], [], []>} : vector<128x32xbf16>, vector<32x32xbf16>, vector<128x32xf32> -> vector<128x32xf32>
    %c0_4 = arith.constant 0 : index
    %c0_5 = arith.constant 0 : index
    %6 = vector.load %arg6[%c0_4, %c0_5] : memref<1x32xf32, #tpu.memory_space<vmem>>, vector<1x32xf32>
    %7 = vector.broadcast %6 : vector<1x32xf32> to vector<128x32xf32>
    %8 = arith.addf %5, %7 : vector<128x32xf32>
    %c0_6 = arith.constant 0 : index
    %c0_7 = arith.constant 0 : index
    %9 = vector.load %arg7[%c0_6, %c0_7] : memref<128x32xf32, #tpu.memory_space<vmem>>, vector<128x32xf32>
    tpu.vector_store %arg7[%c0_6, %c0_7], %8 {strides = array<i32>} : memref<128x32xf32, #tpu.memory_space<vmem>>, vector<128x32xf32>,
    return
  }
  func.func @transform_0(%arg0: i32, %arg1: i32) -> (i32, i32) {
    %c0_i32 = arith.constant 0 : i32
    %c0_i32_0 = arith.constant 0 : i32
    return %arg0, %c0_i32 : i32, i32
  }
  func.func @transform_1(%arg0: i32, %arg1: i32) -> (i32, i32) {
    %c0_i32 = arith.constant 0 : i32
    %c0_i32_0 = arith.constant 0 : i32
    %c0_i32_1 = arith.constant 0 : i32
    return %c0_i32, %c0_i32_0 : i32, i32
  }
  func.func @transform_2(%arg0: i32, %arg1: i32) -> (i32, i32) {
    %c0_i32 = arith.constant 0 : i32
    %c0_i32_0 = arith.constant 0 : i32
    %c0_i32_1 = arith.constant 0 : i32
    return %c0_i32, %c0_i32_0 : i32, i32
  }
  func.func @transform_3(%arg0: i32, %arg1: i32) -> (i32, i32) {
    %c0_i32 = arith.constant 0 : i32
    %c0_i32_0 = arith.constant 0 : i32
    return %c0_i32, %arg1 : i32, i32
  }
  func.func @transform_4(%arg0: i32, %arg1: i32) -> (i32, i32) {
    %c0_i32 = arith.constant 0 : i32
    %c0_i32_0 = arith.constant 0 : i32
    return %c0_i32, %arg1 : i32, i32
  }
  func.func @transform_5(%arg0: i32, %arg1: i32) -> (i32, i32) {
    %c0_i32 = arith.constant 0 : i32
    return %arg0, %arg1 : i32, i32
  }
}

</mosaic_0001>

<bundles_post_ra>
// kernel: mlp_forward.3
= control target key start
LH: loop header
LB: loop body
LE: loop exit
PB: predicated region body
PF: predicated region fallthrough
CT: control target
= control target key end

     0   :  { %vm62_vm0 = vcmask 261120   ;;  %vm248_vm1 = vcmask 257024   ;;  %s497_s1 = inlined_call_operand.vmem [shape: bf16[32,32], index: 1, kind: input, shape index: {}]   ;;  %s498_s0 = inlined_call_operand.vmem [shape: f32[128,32], index: 0, kind: input, shape index: {}]   ;;  %s499_s2 = inlined_call_operand.vmem [shape: f32[1,32], index: 2, kind: input, shape index: {}]   ;;  %s500_s3 = inlined_call_operand.vmem [shape: bf16[128,32], index: 3, kind: output, shape index: {}]  }
   0x1   :  { %v346_v0 = vld [vmem:[%s497_s1 + $0x8] sm:$0xff]   ;;  %v347_v1 = vld [vmem:[%s497_s1] sm:$0xff]   ;;  %v17_v7 = vld [vmem:[%s498_s0 + $0x10] sm:$0xff] }
   0x2   :  { %322 = vmatprep.subr.bf16.mxu0 %v346_v0  ;;  %342 = vmatprep.subr.bf16.mxu1 %v346_v0  ;;  %v15_v2 = vld [vmem:[%s498_s0] sm:$0xff]  ;;  %v16_v3 = vld [vmem:[%s498_s0 + $0x8] sm:$0xff]  ;;  %v18_v8 = vld [vmem:[%s498_s0 + $0x18] sm:$0xff] }
   0x3   :  { %v23_v4 = vld [vmem:[%s498_s0 + $0x40] sm:$0xff]  ;;  %323 = vmatpush3.bf16.msra.mxu0 %v346_v0  ;;  %344 = vmatpush3.bf16.msra.mxu1 %v346_v0  ;;  %v31_v5 = vpack.c.bf16 %v16_v3, %v15_v2  ;;  %v24_v6 = vld [vmem:[%s498_s0 + $0x48] sm:$0xff]  ;;  %v25_v10 = vld [vmem:[%s498_s0 + $0x50] sm:$0xff]  ;;  %v32_v16 = vpack.c.bf16 %v18_v8, %v17_v7 }
   0x4   :  { %324 = vmatprep.subr.bf16.mxu0 %v347_v1  ;;  %343 = vmatprep.subr.bf16.mxu1 %v347_v1  ;;  %v35_v9 = vpack.c.bf16 %v24_v6, %v23_v4  ;;  %v26_v11 = vld [vmem:[%s498_s0 + $0x58] sm:$0xff]  ;;  %v19_v12 = vld [vmem:[%s498_s0 + $0x20] sm:$0xff]  ;;  %v20_v13 = vld [vmem:[%s498_s0 + $0x28] sm:$0xff] }
   0x5   :  { %326 = vmatprep.mubr.msk.bf16.mxu0 %vm62_vm0, %v31_v5  ;;  %v27_v14 = vld [vmem:[%s498_s0 + $0x60] sm:$0xff]  ;;  %v28_v15 = vld [vmem:[%s498_s0 + $0x68] sm:$0xff]  ;;  %v36_v17 = vpack.c.bf16 %v26_v11, %v25_v10  ;;  %v33_v18 = vpack.c.bf16 %v20_v13, %v19_v12  ;;  %v21_v20 = vld [vmem:[%s498_s0 + $0x30] sm:$0xff] }
   0x6   :  { %334 = vmatprep.mubr.msk.bf16.mxu1 %vm62_vm0, %v35_v9  ;;  %v37_v19 = vpack.c.bf16 %v28_v15, %v27_v14  ;;  %v22_v21 = vld [vmem:[%s498_s0 + $0x38] sm:$0xff]  ;;  %v29_v22 = vld [vmem:[%s498_s0 + $0x70] sm:$0xff]  ;;  %v269_v26 = vld [vmem:[%s499_s2] ss:$0 sm:$0xff] }
   0x7   :  { %325 = vmatpush3.bf16.msra.mxu0 %v347_v1  ;;  %345 = vmatpush3.bf16.msra.mxu1 %v347_v1  ;;  %v30_v23 = vld [vmem:[%s498_s0 + $0x78] sm:$0xff]  ;;  %v34_v24 = vpack.c.bf16 %v22_v21, %v21_v20 }
   0x8   :  { %v38_v25 = vpack.c.bf16 %v30_v23, %v29_v22 }
   0xa   :  { %327 = vmatmul.mubr.msk.bf16.vlgmr.msra.gmra.mxu0 %vm62_vm0, %v32_v16  ;;  %335 = vmatmul.mubr.msk.bf16.vlgmr.msra.gmra.mxu1 %vm62_vm0, %v36_v17 }
   0xb   :  { %330 = vmatprep.mubr.msk.bf16.mxu0 %vm62_vm0, %v33_v18  ;;  %338 = vmatprep.mubr.msk.bf16.mxu1 %vm62_vm0, %v37_v19 }
  0x12   :  { %331 = vmatmul.mubr.msk.bf16.gmra.mxu0 %vm62_vm0, %v34_v24  ;;  %339 = vmatmul.mubr.msk.bf16.gmra.mxu1 %vm62_vm0, %v38_v25 }
  0xca   :  { %v328_v27 = vpop.f32.mrf.mxu0  ;;  %v336_v28 = vpop.f32.mrf.mxu1 }
  0xcb   :  { %v130_v29 = vadd.f32 %v328_v27, %v269_v26  ;;  %v162_v30 = vadd.f32 %v336_v28, %v269_v26 }
  0xcc   :  { %v121_v31 = vpop.f32.mrf.mxu0  ;;  %v153_v32 = vpop.f32.mrf.mxu1 }
  0xcd   :  { %v298_v33 = vpack.c.bf16 %v130_v29, %v130_v29  ;;  %v306_v34 = vpack.c.bf16 %v162_v30, %v162_v30  ;;  %v122_v35 = vadd.f32 %v269_v26, %v121_v31  ;;  %v154_v36 = vadd.f32 %v269_v26, %v153_v32 }
  0xce   :  { %v329_v37 = vpop.f32.mrf.mxu0  ;;  %v337_v38 = vpop.f32.mrf.mxu1 }
  0xcf   :  { %251 = vst.msk [vmem:[%s500_s3 + $0x8] sm:$0xf] %vm248_vm1, %v298_v33  ;;  %259 = vst.msk [vmem:[%s500_s3 + $0x28] sm:$0xf] %vm248_vm1, %v306_v34  ;;  %v296_v39 = vpack.c.bf16 %v122_v35, %v122_v35  ;;  %v304_v40 = vpack.c.bf16 %v154_v36, %v154_v36  ;;  %v133_v41 = vadd.f32 %v329_v37, %v269_v26 }
  0xd0   :  { %v165_v42 = vadd.f32 %v337_v38, %v269_v26  ;;  %v124_v43 = vpop.f32.mrf.mxu0  ;;  %v156_v44 = vpop.f32.mrf.mxu1 }
  0xd1   :  { %249 = vst.msk [vmem:[%s500_s3] sm:$0xf] %vm248_vm1, %v296_v39  ;;  %257 = vst.msk [vmem:[%s500_s3 + $0x20] sm:$0xf] %vm248_vm1, %v304_v40  ;;  %v299_v45 = vpack.c.bf16 %v133_v41, %v133_v41  ;;  %v125_v47 = vadd.f32 %v269_v26, %v124_v43  ;;  %v157_v48 = vadd.f32 %v269_v26, %v156_v44 }
  0xd2   :  { %v307_v46 = vpack.c.bf16 %v165_v42, %v165_v42  ;;  %v332_v49 = vpop.f32.mrf.mxu0  ;;  %v340_v50 = vpop.f32.mrf.mxu1 }
  0xd3   :  { %252 = vst.msk [vmem:[%s500_s3 + $0xc] sm:$0xf] %vm248_vm1, %v299_v45  ;;  %v297_v51 = vpack.c.bf16 %v125_v47, %v125_v47  ;;  %v305_v52 = vpack.c.bf16 %v157_v48, %v157_v48  ;;  %v146_v53 = vadd.f32 %v332_v49, %v269_v26  ;;  %v178_v54 = vadd.f32 %v340_v50, %v269_v26 }
  0xd4   :  { %260 = vst.msk [vmem:[%s500_s3 + $0x2c] sm:$0xf] %vm248_vm1, %v307_v46  ;;  %v137_v55 = vpop.f32.mrf.mxu0  ;;  %v169_v56 = vpop.f32.mrf.mxu1 }
  0xd5   :  { %250 = vst.msk [vmem:[%s500_s3 + $0x4] sm:$0xf] %vm248_vm1, %v297_v51  ;;  %258 = vst.msk [vmem:[%s500_s3 + $0x24] sm:$0xf] %vm248_vm1, %v305_v52  ;;  %v302_v57 = vpack.c.bf16 %v146_v53, %v146_v53  ;;  %v310_v58 = vpack.c.bf16 %v178_v54, %v178_v54  ;;  %v138_v59 = vadd.f32 %v269_v26, %v137_v55 }
  0xd6   :  { %v170_v60 = vadd.f32 %v269_v26, %v169_v56  ;;  %v333_v61 = vpop.f32.mrf.mxu0  ;;  %v341_v62 = vpop.f32.mrf.mxu1 }
  0xd7   :  { %255 = vst.msk [vmem:[%s500_s3 + $0x18] sm:$0xf] %vm248_vm1, %v302_v57  ;;  %263 = vst.msk [vmem:[%s500_s3 + $0x38] sm:$0xf] %vm248_vm1, %v310_v58  ;;  %v300_v63 = vpack.c.bf16 %v138_v59, %v138_v59  ;;  %v149_v1 = vadd.f32 %v333_v61, %v269_v26  ;;  %v181_v2 = vadd.f32 %v341_v62, %v269_v26 }
  0xd8   :  { %v308_v0 = vpack.c.bf16 %v170_v60, %v170_v60  ;;  %v140_v3 = vpop.f32.mrf.mxu0  ;;  %v172_v4 = vpop.f32.mrf.mxu1 }
  0xd9   :  { %253 = vst.msk [vmem:[%s500_s3 + $0x10] sm:$0xf] %vm248_vm1, %v300_v63  ;;  %v303_v5 = vpack.c.bf16 %v149_v1, %v149_v1  ;;  %v311_v6 = vpack.c.bf16 %v181_v2, %v181_v2  ;;  %v141_v7 = vadd.f32 %v269_v26, %v140_v3  ;;  %v173_v8 = vadd.f32 %v269_v26, %v172_v4 }
  0xda   :  { %261 = vst.msk [vmem:[%s500_s3 + $0x30] sm:$0xf] %vm248_vm1, %v308_v0 }
  0xdb   :  { %256 = vst.msk [vmem:[%s500_s3 + $0x1c] sm:$0xf] %vm248_vm1, %v303_v5  ;;  %264 = vst.msk [vmem:[%s500_s3 + $0x3c] sm:$0xf] %vm248_vm1, %v311_v6  ;;  %v301_v9 = vpack.c.bf16 %v141_v7, %v141_v7  ;;  %v309_v10 = vpack.c.bf16 %v173_v8, %v173_v8 }
  0xdd   :  { %254 = vst.msk [vmem:[%s500_s3 + $0x14] sm:$0xf] %vm248_vm1, %v301_v9  ;;  %262 = vst.msk [vmem:[%s500_s3 + $0x34] sm:$0xf] %vm248_vm1, %v309_v10 }

// kernel: mlp_forward.4
= control target key start
LH: loop header
LB: loop body
LE: loop exit
PB: predicated region body
PF: predicated region fallthrough
CT: control target
= control target key end

     0   :  { %s875_s12 = smov 0   ;;  %s877_s13 = smov 0   ;;  %s1108_s0 = inlined_call_operand.vmem [shape: bf16[2,8,8,32], index: 0, kind: input, shape index: {}]   ;;  %s1109_s1 = inlined_call_operand.vmem [shape: f32[3,3,32], index: 1, kind: input, shape index: {}]   ;;  %s1110_s2 = inlined_call_operand.vmem [shape: bf16[2,8,8,32], index: 2, kind: output, shape index: {0}]   ;;  %s1111_s3 = inlined_call_operand.vmem [shape: f32[2,2,32], index: 3, kind: output, shape index: {1}]  }
   0x1   :  { %s879_s14 = smov 0  }
   0x2 LB: > { %s23_s15 = sadd.s32 1, %s848_s13  ;;  %p761_p0 = scmp.ge.s32.totalorder %s852_s14, 1  ;;  %s852_s14 = sphi %s879_s14, %s14_s14   ;;  %s848_s13 = sphi %s877_s13, %s1113_s13   ;;  %s844_s12 = sphi %s875_s12, %s1112_s12  }
   0x3   : > { %p24_p1 = scmp.ge.s32.totalorder %s23_s15, 2  ;;  %p170_p2 = scmp.lt.s32.totalorder %s852_s14, 3 }
   0x5   : > { %s1115_s15 = smov (%p24_p1, %s23_s15), 0  ;;  %p171_p3 = pnand %p761_p0, %p170_p2 }
   0x6   : > { %p211_p4 = scmp.lt.s32.totalorder (!%p171_p3), %s844_s12, 1 }
   0x7   : > { %174 = sbr.rel (%p171_p3) target bundleno = 100 (0x64), region = 28 }
   0xc   : > { %vm238_vm0 = vcmask 261120   ;;  %vm240_vm1 = vcmask 254976   ;;  %vm245_vm2 = vcmask 253952   ;;  %v854_v0 = vmov 0.0   ;;  %s1117_s12 = smov (!%p211_p4, %s844_s12), 1 }
   0xd   : > { %239 = vst.msk [vmem:[#allocation2] sm:$0xff] %vm238_vm0, %v854_v0  ;;  %243 = vst.msk [vmem:[#allocation2 + $0x90] sm:$0xff] %vm238_vm0, %v854_v0  ;;  %s784_s16 = sshll.u32 %s1117_s12, 5  ;;  %v932_v1 = vld [vmem:[%s1109_s1 + $0x1] ss:$0 sm:$0xff]  ;;  %vm555_vm3 = vcmask 257024  }
   0xe   : > { %241 = vst.msk [vmem:[#allocation2 + $0x8] sm:$0x3] %vm240_vm1, %v854_v0  ;;  %244 = vst.msk [vmem:[#allocation2 + $0x98] sm:$0x3] %vm240_vm1, %v854_v0  ;;  %s218_s19 = scalar_lea.vmem %s1108_s0, %s784_s16  ;;  %v937_v10 = vld [vmem:[%s1109_s1] ss:$0 sm:$0xff]  ;;  %s1016_s18 = scalar_lea.vmem %s1110_s2, %s784_s16 }
   0xf   : > { %247 = vst.msk [vmem:[#allocation2 + $0x10] sm:$0x1] %vm245_vm2, %v854_v0  ;;  %248 = vst.msk [vmem:[#allocation2 + $0x20] sm:$0x1] %vm245_vm2, %v854_v0  ;;  %v787_v2 = vld [vmem:[%s218_s19] sm:$0xff]   ;;  %v802_v3 = vld [vmem:[%s218_s19 + $0x8] sm:$0xff]  }
  0x10   : > { %249 = vst.msk [vmem:[#allocation2 + $0x30] sm:$0x1] %vm245_vm2, %v854_v0  ;;  %250 = vst.msk [vmem:[#allocation2 + $0x40] sm:$0x1] %vm245_vm2, %v854_v0  ;;  %v803_v4 = vld [vmem:[%s218_s19 + $0x10] sm:$0xff]   ;;  %v788_v5 = vunpack.c.l.bf16 %v787_v2  ;;  %v789_v6 = vunpack.c.h.bf16 %v787_v2  ;;  %v792_v7 = vunpack.c.l.bf16 %v802_v3  ;;  %v793_v8 = vunpack.c.h.bf16 %v802_v3  ;;  %v804_v9 = vld [vmem:[%s218_s19 + $0x18] sm:$0xff]  }
  0x11   : > { %251 = vst.msk [vmem:[#allocation2 + $0x50] sm:$0x1] %vm245_vm2, %v854_v0  ;;  %252 = vst.msk [vmem:[#allocation2 + $0x60] sm:$0x1] %vm245_vm2, %v854_v0  ;;  %v796_v11 = vunpack.c.l.bf16 %v803_v4  ;;  %v797_v12 = vunpack.c.h.bf16 %v803_v4  ;;  %v800_v13 = vunpack.c.l.bf16 %v804_v9  ;;  %v801_v14 = vunpack.c.h.bf16 %v804_v9  ;;  %v942_v16 = vld [vmem:[%s1109_s1 + $0x2] ss:$0 sm:$0xff] }
  0x12   : > { %253 = vst.msk [vmem:[#allocation2 + $0x70] sm:$0x1] %vm245_vm2, %v854_v0  ;;  %254 = vst.msk [vmem:[#allocation2 + $0x80] sm:$0x1] %vm245_vm2, %v854_v0  ;;  %v958_v23 = vld [vmem:[%s1109_s1 + $0x4] ss:$0 sm:$0xff] }
  0x13   : > { %257 = vst.msk [vmem:[#allocation2 + $0x19] sm:$0x1] %vm245_vm2, %v854_v0  ;;  %258 = vst.msk [vmem:[#allocation2 + $0x29] sm:$0x1] %vm245_vm2, %v854_v0  ;;  %v963_v27 = vld [vmem:[%s1109_s1 + $0x5] ss:$0 sm:$0xff] }
  0x14   : > { %259 = vst.msk [vmem:[#allocation2 + $0x39] sm:$0x1] %vm245_vm2, %v854_v0  ;;  %260 = vst.msk [vmem:[#allocation2 + $0x49] sm:$0x1] %vm245_vm2, %v854_v0  ;;  %v970_v31 = vld [vmem:[%s1109_s1 + $0x6] ss:$0 sm:$0xff] }
  0x15   : > { %261 = vst.msk [vmem:[#allocation2 + $0x59] sm:$0x1] %vm245_vm2, %v854_v0  ;;  %262 = vst.msk [vmem:[#allocation2 + $0x69] sm:$0x1] %vm245_vm2, %v854_v0  ;;  %v312_v15 = vld [vmem:[#allocation2 + $0x1] sm:$0xff]  ;;  %s766_s16 = sshll.u32 %s1117_s12, 1 }
  0x16   : > { %263 = vst.msk [vmem:[#allocation2 + $0x79] sm:$0x1] %vm245_vm2, %v854_v0  ;;  %264 = vst.msk [vmem:[#allocation2 + $0x89] sm:$0x1] %vm245_vm2, %v854_v0  ;;  %v325_v18 = vmul.f32 %v932_v1, %v312_v15  ;;  %v977_v37 = vld [vmem:[%s1109_s1 + $0x8] ss:$0 sm:$0xff]  ;;  %s237_s21 = scalar_lea.vmem %s1111_s3, %s766_s16 }
  0x17   : > { %246 = vst.msk [vmem:[#allocation2] sm:$0x1] %vm245_vm2, %v854_v0  ;;  %255 = vst.msk [vmem:[#allocation2 + $0x90] sm:$0x1] %vm245_vm2, %v854_v0  ;;  %v982_v39 = vld [vmem:[%s1109_s1 + $0x9] ss:$0 sm:$0xff] }
  0x18   : > { %256 = vst.msk [vmem:[#allocation2 + $0x9] sm:$0x1] %vm245_vm2, %v854_v0  ;;  %265 = vst.msk [vmem:[#allocation2 + $0x99] sm:$0x1] %vm245_vm2, %v854_v0  ;;  %v989_v44 = vld [vmem:[%s1109_s1 + $0xa] ss:$0 sm:$0xff] }
  0x19   : > { %283 = vst.msk [vmem:[#allocation2 + $0x11] sm:$0xff] %vm238_vm0, %v788_v5  ;;  %284 = vst.msk [vmem:[#allocation2 + $0x21] sm:$0xff] %vm238_vm0, %v789_v6 }
  0x1a   : > { %285 = vst.msk [vmem:[#allocation2 + $0x31] sm:$0xff] %vm238_vm0, %v792_v7  ;;  %286 = vst.msk [vmem:[#allocation2 + $0x41] sm:$0xff] %vm238_vm0, %v793_v8 }
  0x1b   : > { %287 = vst.msk [vmem:[#allocation2 + $0x51] sm:$0xff] %vm238_vm0, %v796_v11  ;;  %288 = vst.msk [vmem:[#allocation2 + $0x61] sm:$0xff] %vm238_vm0, %v797_v12 }
  0x1c   : > { %289 = vst.msk [vmem:[#allocation2 + $0x71] sm:$0xff] %vm238_vm0, %v800_v13  ;;  %290 = vst.msk [vmem:[#allocation2 + $0x81] sm:$0xff] %vm238_vm0, %v801_v14 }
  0x1e   : > { %v291_v17 = vld [vmem:[#allocation2] sm:$0xff] }
  0x1f   : > { %v341_v19 = vld [vmem:[#allocation2 + $0x2] sm:$0xff]  ;;  %v304_v20 = vmul.f32 %v937_v10, %v291_v17 }
  0x20   : > { %v354_v21 = vmul.f32 %v942_v16, %v341_v19  ;;  %v370_v25 = vld [vmem:[#allocation2 + $0x10] sm:$0xff]  ;;  %v459_v32 = vld [vmem:[#allocation2 + $0x20] sm:$0xff] }
  0x21   : > { %v333_v22 = vadd.f32 %v325_v18, %v304_v20  ;;  %v400_v26 = vld [vmem:[#allocation2 + $0x11] sm:$0xff]  ;;  %v384_v28 = vmul.f32 %v958_v23, %v370_v25  ;;  %v305_v30 = vmul.f32 %v937_v10, %v370_v25  ;;  %v489_v33 = vld [vmem:[#allocation2 + $0x21] sm:$0xff]  ;;  %v306_v46 = vmul.f32 %v937_v10, %v459_v32 }
  0x22   : > { %v429_v29 = vld [vmem:[#allocation2 + $0x12] sm:$0xff]  ;;  %v326_v34 = vmul.f32 %v932_v1, %v400_v26  ;;  %v413_v36 = vmul.f32 %v963_v27, %v400_v26  ;;  %v518_v38 = vld [vmem:[#allocation2 + $0x22] sm:$0xff]  ;;  %v327_v47 = vmul.f32 %v932_v1, %v489_v33  ;;  %v473_v48 = vmul.f32 %v977_v37, %v459_v32 }
  0x23   : > { %v362_v24 = vadd.f32 %v354_v21, %v333_v22  ;;  %v355_v41 = vmul.f32 %v942_v16, %v429_v29  ;;  %v442_v43 = vmul.f32 %v970_v31, %v429_v29  ;;  %v460_v45 = vld [vmem:[#allocation2 + $0x30] sm:$0xff]  ;;  %v385_v50 = vmul.f32 %v958_v23, %v459_v32  ;;  %v461_v0 = vld [vmem:[#allocation2 + $0x40] sm:$0xff] }
  0x24   : > { %v334_v40 = vadd.f32 %v326_v34, %v305_v30  ;;  %v490_v51 = vld [vmem:[#allocation2 + $0x31] sm:$0xff]  ;;  %v356_v53 = vmul.f32 %v942_v16, %v518_v38  ;;  %v502_v55 = vmul.f32 %v982_v39, %v489_v33  ;;  %v335_v56 = vadd.f32 %v327_v47, %v306_v46  ;;  %v491_v8 = vld [vmem:[#allocation2 + $0x41] sm:$0xff] }
  0x25   : > { %v392_v35 = vadd.f32 %v384_v28, %v362_v24  ;;  %v519_v52 = vld [vmem:[#allocation2 + $0x32] sm:$0xff]  ;;  %v386_v57 = vmul.f32 %v958_v23, %v460_v45  ;;  %v531_v58 = vmul.f32 %v989_v44, %v518_v38  ;;  %v414_v60 = vmul.f32 %v963_v27, %v489_v33  ;;  %v520_v13 = vld [vmem:[#allocation2 + $0x42] sm:$0xff] }
  0x26   : > { %v363_v49 = vadd.f32 %v355_v41, %v334_v40  ;;  %v307_v61 = vmul.f32 %v937_v10, %v460_v45  ;;  %v364_v63 = vadd.f32 %v356_v53, %v335_v56  ;;  %v328_v2 = vmul.f32 %v932_v1, %v490_v51  ;;  %v462_v40 = vld [vmem:[#allocation2 + $0x50] sm:$0xff] }
  0x27   : > { %v421_v42 = vadd.f32 %v413_v36, %v392_v35  ;;  %v357_v3 = vmul.f32 %v942_v16, %v519_v52  ;;  %v443_v5 = vmul.f32 %v970_v31, %v518_v38  ;;  %v474_v6 = vmul.f32 %v977_v37, %v460_v45  ;;  %v492_v41 = vld [vmem:[#allocation2 + $0x51] sm:$0xff] }
  0x28   : > { %v393_v59 = vadd.f32 %v385_v50, %v363_v49  ;;  %v503_v7 = vmul.f32 %v982_v39, %v490_v51  ;;  %v394_v11 = vadd.f32 %v386_v57, %v364_v63  ;;  %v415_v12 = vmul.f32 %v963_v27, %v490_v51  ;;  %v521_v47 = vld [vmem:[#allocation2 + $0x52] sm:$0xff] }
  0x29   : > { %v450_v54 = vadd.f32 %v442_v43, %v421_v42  ;;  %v336_v14 = vadd.f32 %v328_v2, %v307_v61  ;;  %v444_v17 = vmul.f32 %v970_v31, %v519_v52  ;;  %v387_v18 = vmul.f32 %v958_v23, %v461_v0 }
  0x2a   : > { %v422_v4 = vadd.f32 %v414_v60, %v393_v59  ;;  %v308_v19 = vmul.f32 %v937_v10, %v461_v0  ;;  %v423_v21 = vadd.f32 %v415_v12, %v394_v11  ;;  %v329_v24 = vmul.f32 %v932_v1, %v491_v8 }
  0x2b   : > { %v481_v62 = vadd.f32 %v473_v48, %v450_v54  ;;  %v365_v22 = vadd.f32 %v357_v3, %v336_v14  ;;  %v532_v26 = vmul.f32 %v989_v44, %v519_v52  ;;  %v416_v28 = vmul.f32 %v963_v27, %v491_v8 }
  0x2c   : > { %v451_v15 = vadd.f32 %v443_v5, %v422_v4  ;;  %v358_v29 = vmul.f32 %v942_v16, %v520_v13  ;;  %v452_v32 = vadd.f32 %v444_v17, %v423_v21  ;;  %v475_v33 = vmul.f32 %v977_v37, %v461_v0  ;;  %v463_v0 = vld [vmem:[#allocation2 + $0x60] sm:$0xff] }
  0x2d   : > { %v510_v9 = vadd.f32 %v502_v55, %v481_v62  ;;  %v504_v34 = vmul.f32 %v982_v39, %v491_v8  ;;  %v533_v36 = vmul.f32 %v989_v44, %v520_v13  ;;  %v395_v38 = vadd.f32 %v387_v18, %v365_v22  ;;  %v522_v17 = vld [vmem:[#allocation2 + $0x62] sm:$0xff] }
  0x2e   : > { %v482_v25 = vadd.f32 %v474_v6, %v451_v15  ;;  %v337_v42 = vadd.f32 %v329_v24, %v308_v19  ;;  %v483_v43 = vadd.f32 %v475_v33, %v452_v32  ;;  %v445_v45 = vmul.f32 %v970_v31, %v520_v13  ;;  %v493_v15 = vld [vmem:[#allocation2 + $0x61] sm:$0xff] }
  0x2f   : > { %v539_v20 = vadd.f32 %v531_v58, %v510_v9  ;;  %v476_v46 = vmul.f32 %v977_v37, %v462_v40  ;;  %v388_v48 = vmul.f32 %v958_v23, %v462_v40  ;;  %v424_v50 = vadd.f32 %v416_v28, %v395_v38 }
  0x30   : > { %v511_v35 = vadd.f32 %v503_v7, %v482_v25  ;;  %v505_v51 = vmul.f32 %v982_v39, %v492_v41  ;;  %v366_v52 = vadd.f32 %v358_v29, %v337_v42  ;;  %v512_v54 = vadd.f32 %v504_v34, %v483_v43  ;;  %v464_v29 = vld [vmem:[#allocation2 + $0x70] sm:$0xff] }
  0x31   : > { %v547_v30 = vpack.c.bf16 %v539_v20, %v539_v20  ;;  %v585_v53 = vmul.f32 %v539_v20, %v539_v20  ;;  %v309_v55 = vmul.f32 %v937_v10, %v462_v40  ;;  %v330_v56 = vmul.f32 %v932_v1, %v492_v41 }
  0x32   : > { %v540_v49 = vadd.f32 %v532_v26, %v511_v35  ;;  %v453_v58 = vadd.f32 %v445_v45, %v424_v50  ;;  %v417_v59 = vmul.f32 %v963_v27, %v492_v41  ;;  %v359_v60 = vmul.f32 %v942_v16, %v521_v47  ;;  %v494_v41 = vld [vmem:[#allocation2 + $0x71] sm:$0xff] }
  0x33   : > { %556 = vst.msk [vmem:[%s1016_s18] sm:$0xf] %vm555_vm3, %v547_v30  ;;  %v541_v62 = vadd.f32 %v533_v36, %v512_v54  ;;  %v396_v63 = vadd.f32 %v388_v48, %v366_v52  ;;  %v338_v2 = vadd.f32 %v330_v56, %v309_v55  ;;  %v446_v5 = vmul.f32 %v970_v31, %v521_v47  ;;  %v523_v45 = vld [vmem:[#allocation2 + $0x72] sm:$0xff] }
  0x34   : > { %v548_v57 = vpack.c.bf16 %v540_v49, %v540_v49  ;;  %v586_v61 = vmul.f32 %v540_v49, %v540_v49  ;;  %v565_v3 = vsel %vm238_vm0, %v540_v49, 0.0  ;;  %v484_v4 = vadd.f32 %v476_v46, %v453_v58 }
  0x35   : > { %v389_v6 = vmul.f32 %v958_v23, %v463_v0  ;;  %v564_v7 = vsel %vm238_vm0, %v539_v20, 0.0  ;;  %v593_v8 = vsel %vm238_vm0, %v585_v53, 0.0  ;;  %v549_v9 = vpack.c.bf16 %v541_v62, %v541_v62 }
  0x36   : > { %557 = vst.msk [vmem:[%s1016_s18 + $0x4] sm:$0xf] %vm555_vm3, %v548_v57  ;;  %v534_v11 = vmul.f32 %v989_v44, %v521_v47  ;;  %v513_v12 = vadd.f32 %v505_v51, %v484_v4  ;;  %v425_v13 = vadd.f32 %v417_v59, %v396_v63  ;;  %v477_v14 = vmul.f32 %v977_v37, %v463_v0  ;;  %v465_v59 = vld [vmem:[#allocation2 + $0x80] sm:$0xff] }
  0x37   : > { %v367_v18 = vadd.f32 %v359_v60, %v338_v2  ;;  %v566_v19 = vadd.f32 %v565_v3, %v564_v7  ;;  %v594_v21 = vsel %vm238_vm0, %v586_v61, 0.0  ;;  %558 = vst.msk [vmem:[%s1016_s18 + $0x8] sm:$0xf] %vm555_vm3, %v549_v9  ;;  %v506_v22 = vmul.f32 %v982_v39, %v493_v15 }
  0x38   : > { %v418_v20 = vmul.f32 %v963_v27, %v493_v15  ;;  %v587_v24 = vmul.f32 %v541_v62, %v541_v62  ;;  %v542_v25 = vadd.f32 %v534_v11, %v513_v12  ;;  %v454_v26 = vadd.f32 %v446_v5, %v425_v13 }
  0x39   : > { %v397_v28 = vadd.f32 %v389_v6, %v367_v18  ;;  %v447_v30 = vmul.f32 %v970_v31, %v522_v17  ;;  %v310_v32 = vmul.f32 %v937_v10, %v463_v0  ;;  %v331_v33 = vmul.f32 %v932_v1, %v493_v15  ;;  %v495_v6 = vld [vmem:[#allocation2 + $0x81] sm:$0xff] }
  0x3a   : > { %v360_v34 = vmul.f32 %v942_v16, %v522_v17  ;;  %v595_v35 = vadd.f32 %v594_v21, %v593_v8  ;;  %v567_v36 = vsel %vm238_vm0, %v541_v62, 0.0  ;;  %v550_v38 = vpack.c.bf16 %v542_v25, %v542_v25 }
  0x3b   : > { %v485_v40 = vadd.f32 %v477_v14, %v454_v26  ;;  %v426_v42 = vadd.f32 %v418_v20, %v397_v28  ;;  %v478_v43 = vmul.f32 %v977_v37, %v464_v29  ;;  %v339_v46 = vadd.f32 %v331_v33, %v310_v32  ;;  %v496_v32 = vld [vmem:[#allocation2 + $0x91] sm:$0xff] }
  0x3c   : > { %v390_v47 = vmul.f32 %v958_v23, %v464_v29  ;;  %v568_v48 = vadd.f32 %v567_v36, %v566_v19  ;;  %v596_v49 = vsel %vm238_vm0, %v587_v24, 0.0  ;;  %559 = vst.msk [vmem:[%s1016_s18 + $0xc] sm:$0xf] %vm555_vm3, %v550_v38  ;;  %v535_v51 = vmul.f32 %v989_v44, %v522_v17  ;;  %v525_v38 = vld [vmem:[#allocation2 + $0x92] sm:$0xff] }
  0x3d   : > { %v514_v50 = vadd.f32 %v506_v22, %v485_v40  ;;  %v455_v52 = vadd.f32 %v447_v30, %v426_v42  ;;  %v507_v53 = vmul.f32 %v982_v39, %v494_v41  ;;  %v368_v54 = vadd.f32 %v360_v34, %v339_v46 }
  0x3e   : > { %v419_v55 = vmul.f32 %v963_v27, %v494_v41  ;;  %v597_v56 = vadd.f32 %v596_v49, %v595_v35  ;;  %v448_v58 = vmul.f32 %v970_v31, %v523_v45  ;;  %v311_v60 = vmul.f32 %v937_v10, %v464_v29  ;;  %v524_v10 = vld [vmem:[#allocation2 + $0x82] sm:$0xff] }
  0x3f   : > { %v543_v57 = vadd.f32 %v535_v51, %v514_v50  ;;  %v486_v61 = vadd.f32 %v478_v43, %v455_v52  ;;  %v398_v62 = vadd.f32 %v390_v47, %v368_v54  ;;  %v332_v63 = vmul.f32 %v932_v1, %v494_v41 }
  0x40   : > { %v361_v0 = vmul.f32 %v942_v16, %v523_v45  ;;  %v569_v2 = vsel %vm238_vm0, %v542_v25, 0.0  ;;  %v588_v3 = vmul.f32 %v542_v25, %v542_v25  ;;  %v536_v5 = vmul.f32 %v989_v44, %v523_v45  ;;  %v466_v25 = vld [vmem:[#allocation2 + $0x90] sm:$0xff] }
  0x41   : > { %v551_v4 = vpack.c.bf16 %v543_v57, %v543_v57  ;;  %v515_v7 = vadd.f32 %v507_v53, %v486_v61  ;;  %v427_v8 = vadd.f32 %v419_v55, %v398_v62  ;;  %v479_v9 = vmul.f32 %v977_v37, %v465_v59 }
  0x42   : > { %v340_v11 = vadd.f32 %v332_v63, %v311_v60  ;;  %v570_v12 = vadd.f32 %v569_v2, %v568_v48  ;;  %v391_v1 = vmul.f32 %v958_v23, %v465_v59  ;;  %v508_v14 = vmul.f32 %v982_v39, %v495_v6 }
  0x43   : > { %560 = vst.msk [vmem:[%s1016_s18 + $0x10] sm:$0xf] %vm555_vm3, %v551_v4  ;;  %v544_v13 = vadd.f32 %v536_v5, %v515_v7  ;;  %v456_v16 = vadd.f32 %v448_v58, %v427_v8  ;;  %v598_v17 = vsel %vm238_vm0, %v588_v3, 0.0  ;;  %v589_v18 = vmul.f32 %v543_v57, %v543_v57 }
  0x44   : > { %v369_v15 = vadd.f32 %v361_v0, %v340_v11  ;;  %v420_v19 = vmul.f32 %v963_v27, %v495_v6  ;;  %v599_v21 = vadd.f32 %v598_v17, %v597_v56  ;;  %v537_v24 = vmul.f32 %v989_v44, %v524_v10 }
  0x45   : > { %v552_v22 = vpack.c.bf16 %v544_v13, %v544_v13  ;;  %v487_v20 = vadd.f32 %v479_v9, %v456_v16  ;;  %v571_v26 = vsel %vm238_vm0, %v543_v57, 0.0  ;;  %v449_v28 = vmul.f32 %v970_v31, %v524_v10 }
  0x46   : > { %v399_v23 = vadd.f32 %v391_v1, %v369_v15  ;;  %v572_v29 = vadd.f32 %v571_v26, %v570_v12  ;;  %v600_v33 = vsel %vm238_vm0, %v589_v18, 0.0  ;;  %v590_v27 = vmul.f32 %v544_v13, %v544_v13 }
  0x47   : > { %561 = vst.msk [vmem:[%s1016_s18 + $0x14] sm:$0xf] %vm555_vm3, %v552_v22  ;;  %v516_v30 = vadd.f32 %v508_v14, %v487_v20  ;;  %v480_v35 = vmul.f32 %v977_v37, %v466_v25  ;;  %v601_v40 = vadd.f32 %v600_v33, %v599_v21  ;;  %v573_v41 = vsel %vm238_vm0, %v544_v13, 0.0 }
  0x48   : > { %v428_v34 = vadd.f32 %v420_v19, %v399_v23  ;;  %v509_v31 = vmul.f32 %v982_v39, %v496_v32  ;;  %v574_v45 = vadd.f32 %v573_v41, %v572_v29  ;;  %v538_v48 = vmul.f32 %v989_v44, %v525_v38 }
  0x49   : > { %v545_v36 = vadd.f32 %v537_v24, %v516_v30  ;;  %v602_v49 = vsel %vm238_vm0, %v590_v27, 0.0 }
  0x4a   : > { %v457_v42 = vadd.f32 %v449_v28, %v428_v34  ;;  %v603_v37 = vadd.f32 %v602_v49, %v601_v40 }
  0x4b   : > { %v553_v43 = vpack.c.bf16 %v545_v36, %v545_v36  ;;  %v591_v46 = vmul.f32 %v545_v36, %v545_v36  ;;  %v575_v51 = vsel %vm238_vm0, %v545_v36, 0.0 }
  0x4c   : > { %v488_v47 = vadd.f32 %v480_v35, %v457_v42  ;;  %v576_v52 = vadd.f32 %v575_v51, %v574_v45 }
  0x4d   : > { %562 = vst.msk [vmem:[%s1016_s18 + $0x18] sm:$0xf] %vm555_vm3, %v553_v43  ;;  %v604_v39 = vsel %vm238_vm0, %v591_v46, 0.0 }
  0x4e   : > { %v517_v50 = vadd.f32 %v509_v31, %v488_v47  ;;  %v605_v54 = vadd.f32 %v604_v39, %v603_v37 }
  0x50   : > { %v546_v53 = vadd.f32 %v538_v48, %v517_v50 }
  0x52   : > { %v554_v55 = vpack.c.bf16 %v546_v53, %v546_v53  ;;  %v577_v56 = vsel %vm238_vm0, %v546_v53, 0.0  ;;  %v592_v57 = vmul.f32 %v546_v53, %v546_v53 }
  0x53   : > { %v578_v58 = vadd.f32 %v577_v56, %v576_v52 }
  0x54   : > { %563 = vst.msk [vmem:[%s1016_s18 + $0x1c] sm:$0xf] %vm555_vm3, %v554_v55  ;;  %v606_v44 = vsel %vm238_vm0, %v592_v57, 0.0 }
  0x55   : > { %v579_v59 = vrot.slane %v578_v58, 4  ;;  %v607_v60 = vadd.f32 %v606_v44, %v605_v54 }
  0x57   : > { %v580_v61 = vadd.f32 %v579_v59, %v578_v58  ;;  %v608_v62 = vrot.slane %v607_v60, 4 }
  0x59   : > { %v581_v63 = vrot.slane %v580_v61, 2  ;;  %v609_v0 = vadd.f32 %v608_v62, %v607_v60 }
  0x5b   : > { %v582_v2 = vadd.f32 %v581_v63, %v580_v61  ;;  %v610_v3 = vrot.slane %v609_v0, 2 }
  0x5d   : > { %v583_v4 = vrot.slane %v582_v2, 1  ;;  %v611_v5 = vadd.f32 %v610_v3, %v609_v0 }
  0x5f   : > { %v584_v6 = vadd.f32 %v583_v4, %v582_v2  ;;  %v612_v7 = vrot.slane %v611_v5, 1 }
  0x61   : > { %614 = vst.msk [vmem:[%s237_s21] sm:$0x1] %vm245_vm2, %v584_v6  ;;  %v613_v8 = vadd.f32 %v612_v7, %v611_v5 }
  0x63   : > { %615 = vst.msk [vmem:[%s237_s21 + $0x1] sm:$0x1] %vm245_vm2, %v613_v8 }
  0x64 PF: > { %s14_s14 = sadd.s32 1, %s852_s14   ;;  %s1112_s12 = smov %s848_s13 }
  0x65   : > { %p11_p5 = scmp.ge.s32.totalorder %s14_s14, 4   ;;  %s1113_s13 = smov %s1115_s15 }
  0x67   :  { %13 = sbr.rel (!%p11_p5) target bundleno = 2 (0x2), region = 78 }

// kernel: mlp_forward.5
= control target key start
LH: loop header
LB: loop body
LE: loop exit
PB: predicated region body
PF: predicated region fallthrough
CT: control target
= control target key end

     0   :  { %vm583_vm4 = vcmask 257024   ;;  %vm679_vm7 = vcmask 261120   ;;  %s1486_s3 = inlined_call_operand.vmem [shape: bf16[32,32], index: 3, kind: input, shape index: {}]   ;;  %s1487_s0 = inlined_call_operand.vmem [shape: bf16[128,32], index: 0, kind: input, shape index: {}]   ;;  %s1488_s1 = inlined_call_operand.vmem [shape: f32[1,32], index: 1, kind: input, shape index: {}]   ;;  %s1489_s2 = inlined_call_operand.vmem [shape: f32[1,32], index: 2, kind: input, shape index: {}]   ;;  %s1490_s4 = inlined_call_operand.vmem [shape: f32[1,32], index: 4, kind: input, shape index: {}]   ;;  %s1491_s5 = inlined_call_operand.vmem [shape: f32[128,32], index: 5, kind: output, shape index: {}]  }
   0x1   :  { %v947_v0 = vld [vmem:[%s1486_s3 + $0x8] sm:$0xff]   ;;  %v948_v1 = vld [vmem:[%s1486_s3] sm:$0xff]   ;;  %v907_v35 = vld [vmem:[%s1487_s0 + $0x10] sm:$0xff]  }
   0x2   :  { %923 = vmatprep.subr.bf16.mxu0 %v947_v0  ;;  %943 = vmatprep.subr.bf16.mxu1 %v947_v0  ;;  %v875_v2 = vld [vmem:[%s1487_s0] sm:$0xff]   ;;  %v906_v7 = vld [vmem:[%s1487_s0 + $0x8] sm:$0xff]   ;;  %v884_v51 = vunpack.c.l.bf16 %v907_v35 }
   0x3   :  { %v1063_v3 = vld [vmem:[%s1488_s1] ss:$0 sm:$0xff]  ;;  %924 = vmatpush3.bf16.msra.mxu0 %v947_v0  ;;  %945 = vmatpush3.bf16.msra.mxu1 %v947_v0  ;;  %v876_v4 = vunpack.c.l.bf16 %v875_v2  ;;  %v877_v5 = vunpack.c.h.bf16 %v875_v2  ;;  %v880_v11 = vunpack.c.l.bf16 %v906_v7  ;;  %v881_v18 = vunpack.c.h.bf16 %v906_v7  ;;  %v910_v22 = vld [vmem:[%s1487_s0 + $0x28] sm:$0xff]  }
   0x4   :  { %v909_v6 = vld [vmem:[%s1487_s0 + $0x20] sm:$0xff]   ;;  %925 = vmatprep.subr.bf16.mxu0 %v948_v1  ;;  %944 = vmatprep.subr.bf16.mxu1 %v948_v1  ;;  %v896_v30 = vunpack.c.l.bf16 %v910_v22  ;;  %v897_v34 = vunpack.c.h.bf16 %v910_v22 }
   0x5   :  { %v1074_v8 = vld [vmem:[%s1489_s2] ss:$0 sm:$0xff]  ;;  %v892_v9 = vunpack.c.l.bf16 %v909_v6  ;;  %v893_v10 = vunpack.c.h.bf16 %v909_v6  ;;  %v64_v12 = vmul.f32 %v876_v4, %v1063_v3  ;;  %v65_v13 = vmul.f32 %v877_v5, %v1063_v3 }
   0x6   :  { %v66_v21 = vmul.f32 %v880_v11, %v1063_v3  ;;  %v67_v29 = vmul.f32 %v881_v18, %v1063_v3  ;;  %v74_v50 = vmul.f32 %v896_v30, %v1063_v3  ;;  %v75_v61 = vmul.f32 %v897_v34, %v1063_v3 }
   0x7   :  { %v72_v14 = vmul.f32 %v892_v9, %v1063_v3  ;;  %v73_v15 = vmul.f32 %v893_v10, %v1063_v3  ;;  %926 = vmatpush3.bf16.msra.mxu0 %v948_v1  ;;  %946 = vmatpush3.bf16.msra.mxu1 %v948_v1  ;;  %v87_v16 = vadd.f32 %v1074_v8, %v64_v12  ;;  %v885_v9 = vunpack.c.h.bf16 %v907_v35 }
   0x8   :  { %v88_v17 = vadd.f32 %v1074_v8, %v65_v13  ;;  %v89_v33 = vadd.f32 %v1074_v8, %v66_v21  ;;  %v90_v47 = vadd.f32 %v1074_v8, %v67_v29  ;;  %v97_v1 = vadd.f32 %v1074_v8, %v74_v50 }
   0x9   :  { %v95_v19 = vadd.f32 %v1074_v8, %v72_v14  ;;  %v96_v20 = vadd.f32 %v1074_v8, %v73_v15  ;;  %v1088_v23 = vmul.f32 0.70710677, %v87_v16  ;;  %v1106_v48 = vmul.f32 0.5, %v87_v16 }
   0xa   :  { %v1090_v24 = vmul.f32 0.70710677, %v88_v17  ;;  %v1109_v52 = vmul.f32 0.5, %v88_v17  ;;  %v1113_v59 = vmul.f32 0.70710677, %v89_v33  ;;  %v1120_v0 = vmul.f32 0.5, %v89_v33 }
   0xb   :  { %v1092_v25 = vmul.f32 0.70710677, %v95_v19  ;;  %v1094_v26 = vmul.f32 0.70710677, %v96_v20  ;;  %v135_v27 = vand.u32 2147483647, %v1088_v23  ;;  %v98_v7 = vadd.f32 %v1074_v8, %v75_v61 }
   0xc   :  { %v136_v28 = vand.u32 2147483647, %v1090_v24  ;;  %v1111_v55 = vmul.f32 0.5, %v95_v19  ;;  %v1115_v60 = vmul.f32 0.70710677, %v90_v47  ;;  %v1118_v63 = vmul.f32 0.5, %v96_v20 }
   0xd   :  { %v143_v31 = vand.u32 2147483647, %v1092_v25  ;;  %v144_v32 = vand.u32 2147483647, %v1094_v26  ;;  %v151_v36 = vmul.f32 0.3275911, %v135_v27  ;;  %v68_v15 = vmul.f32 %v884_v51, %v1063_v3 }
   0xe   :  { %v152_v37 = vmul.f32 0.3275911, %v136_v28  ;;  %v343_v38 = vsub.f32 0.0, %v135_v27  ;;  %v344_v39 = vsub.f32 0.0, %v136_v28  ;;  %v137_v4 = vand.u32 2147483647, %v1113_v59 }
   0xf   :  { %v159_v40 = vmul.f32 0.3275911, %v143_v31  ;;  %v160_v41 = vmul.f32 0.3275911, %v144_v32  ;;  %v351_v42 = vsub.f32 0.0, %v143_v31  ;;  %v352_v43 = vsub.f32 0.0, %v144_v32 }
  0x10   :  { %v167_v44 = vadd.f32 1.0, %v151_v36  ;;  %v168_v45 = vadd.f32 1.0, %v152_v37  ;;  %v359_v46 = vmul.f32 %v343_v38, %v135_v27  ;;  %v360_v49 = vmul.f32 %v344_v39, %v136_v28 }
  0x11   :  { %v175_v53 = vadd.f32 1.0, %v159_v40  ;;  %v367_v54 = vmul.f32 %v351_v42, %v143_v31  ;;  %v176_v56 = vadd.f32 1.0, %v160_v41  ;;  %v368_v57 = vmul.f32 %v352_v43, %v144_v32 }
  0x12   :  { %957 = vrcp.f32 %v167_v44  ;;  %v375_v58 = vmul.f32 1.442695, %v359_v46  ;;  %v377_v62 = vmul.f32 1.442695, %v360_v49  ;;  %v138_v5 = vand.u32 2147483647, %v1115_v60 }
  0x13   :  { %959 = vrcp.f32 %v168_v45  ;;  %v391_v2 = vmul.f32 1.442695, %v367_v54  ;;  %v393_v6 = vmul.f32 1.442695, %v368_v57  ;;  %v153_v10 = vmul.f32 0.3275911, %v137_v4 }
  0x14   :  { %961 = vrcp.f32 %v175_v53  ;;  %v154_v11 = vmul.f32 0.3275911, %v138_v5  ;;  %v345_v12 = vsub.f32 0.0, %v137_v4  ;;  %v346_v13 = vsub.f32 0.0, %v138_v5  ;;  %v1152_v45 = vld [vmem:[%s1487_s0 + $0x30] sm:$0xff]  }
  0x15   :  { %963 = vrcp.f32 %v176_v56  ;;  %v1126_v14 = vmul.f32 0.70710677, %v97_v1  ;;  %v169_v16 = vadd.f32 1.0, %v153_v10  ;;  %v1129_v19 = vmul.f32 0.70710677, %v98_v7 }
  0x16   :  { %965 = vpow2.f32 %v375_v58  ;;  %v170_v17 = vadd.f32 1.0, %v154_v11  ;;  %v361_v18 = vmul.f32 %v345_v12, %v137_v4  ;;  %v362_v20 = vmul.f32 %v346_v13, %v138_v5 }
  0x17   :  { %967 = vpow2.f32 %v377_v62  ;;  %v145_v21 = vand.u32 2147483647, %v1126_v14  ;;  %v69_v22 = vmul.f32 %v885_v9, %v1063_v3  ;;  %v1133_v27 = vmul.f32 0.5, %v90_v47 }
  0x18   :  { %969 = vpow2.f32 %v391_v2  ;;  %v379_v28 = vmul.f32 1.442695, %v361_v18  ;;  %v146_v29 = vand.u32 2147483647, %v1129_v19  ;;  %v1136_v30 = vmul.f32 0.5, %v97_v1 }
  0x19   :  { %971 = vrcp.f32 %v169_v16  ;;  %v161_v31 = vmul.f32 0.3275911, %v145_v21  ;;  %v353_v32 = vsub.f32 0.0, %v145_v21  ;;  %v1139_v35 = vadd.f32 %v1074_v8, %v68_v15 }
  0x1a   :  { %973 = vrcp.f32 %v170_v17  ;;  %v162_v33 = vmul.f32 0.3275911, %v146_v29  ;;  %v354_v34 = vsub.f32 0.0, %v146_v29  ;;  %v381_v37 = vmul.f32 1.442695, %v362_v20 }
  0x1b   :  { %975 = vpow2.f32 %v393_v6  ;;  %v177_v38 = vadd.f32 1.0, %v161_v31  ;;  %v369_v39 = vmul.f32 %v353_v32, %v145_v21  ;;  %v1144_v40 = vadd.f32 %v1074_v8, %v69_v22 }
  0x1c   :  { %977 = vpow2.f32 %v379_v28  ;;  %v178_v43 = vadd.f32 1.0, %v162_v33  ;;  %v370_v44 = vmul.f32 %v354_v34, %v146_v29  ;;  %v1155_v47 = vmul.f32 0.5, %v98_v7 }
  0x1d   :  { %979 = vrcp.f32 %v177_v38  ;;  %v395_v49 = vmul.f32 1.442695, %v369_v39  ;;  %v1158_v53 = vmul.f32 0.70710677, %v1139_v35  ;;  %v1163_v57 = vmul.f32 0.70710677, %v1144_v40 }
  0x1e   :  { %981 = vrcp.f32 %v178_v43  ;;  %v397_v51 = vmul.f32 1.442695, %v370_v44  ;;  %v900_v58 = vunpack.c.l.bf16 %v1152_v45  ;;  %v901_v13 = vunpack.c.h.bf16 %v1152_v45 }
  0x1f   :  { %v1141_v36 = vpop.eup %957  ;;  %983 = vpow2.f32 %v381_v37  ;;  %v139_v2 = vand.u32 2147483647, %v1158_v53  ;;  %v140_v7 = vand.u32 2147483647, %v1163_v57  ;;  %vm439_vm0 = vcmp.ge.f32.partialorder %v1088_v23, 0.0 }
  0x20   :  { %v1146_v41 = vpop.eup %959  ;;  %v199_v42 = vmul.f32 1.0614054, %v1141_v36  ;;  %985 = vpow2.f32 %v395_v49  ;;  %v1180_v18 = vmul.f32 %v900_v58, %v1063_v3  ;;  %vm440_vm1 = vcmp.ge.f32.partialorder %v1090_v24, 0.0 }
  0x21   :  { %v200_v46 = vmul.f32 1.0614054, %v1146_v41  ;;  %v1160_v54 = vpop.eup %961  ;;  %987 = vpow2.f32 %v397_v51  ;;  %v155_v12 = vmul.f32 0.3275911, %v139_v2  ;;  %v156_v17 = vmul.f32 0.3275911, %v140_v7 }
  0x22   :  { %v215_v50 = vadd.f32 -1.4531521, %v199_v42  ;;  %v1166_v61 = vpop.eup %963  ;;  %v207_v1 = vmul.f32 1.0614054, %v1160_v54  ;;  %v347_v29 = vsub.f32 0.0, %v139_v2  ;;  %v348_v37 = vsub.f32 0.0, %v140_v7 }
  0x23   :  { %v216_v56 = vadd.f32 -1.4531521, %v200_v46  ;;  %v1171_v4 = vpop.eup %965  ;;  %v208_v6 = vmul.f32 1.0614054, %v1166_v61  ;;  %v171_v28 = vadd.f32 1.0, %v155_v12  ;;  %v172_v34 = vadd.f32 1.0, %v156_v17 }
  0x24   :  { %v231_v62 = vmul.f32 %v1141_v36, %v215_v50  ;;  %v1176_v9 = vpop.eup %967  ;;  %v223_v11 = vadd.f32 -1.4531521, %v207_v1  ;;  %vm447_vm2 = vcmp.ge.f32.partialorder %v1092_v25, 0.0  ;;  %vm448_vm3 = vcmp.ge.f32.partialorder %v1094_v26, 0.0 }
  0x25   :  { %v232_v5 = vmul.f32 %v1146_v41, %v216_v56  ;;  %v224_v16 = vadd.f32 -1.4531521, %v208_v6  ;;  %v1182_v20 = vpop.eup %969  ;;  %989 = vrcp.f32 %v171_v28  ;;  %vm441_vm5 = vcmp.ge.f32.partialorder %v1113_v59, 0.0 }
  0x26   :  { %v247_v10 = vadd.f32 1.4214138, %v231_v62  ;;  %v239_v22 = vmul.f32 %v1160_v54, %v223_v11  ;;  %v1186_v31 = vpop.eup %971  ;;  %991 = vrcp.f32 %v172_v34  ;;  %v363_v62 = vmul.f32 %v347_v29, %v139_v2 }
  0x27   :  { %v248_v15 = vadd.f32 1.4214138, %v232_v5  ;;  %v240_v33 = vmul.f32 %v1166_v61, %v224_v16  ;;  %v1190_v38 = vpop.eup %973  ;;  %v201_v43 = vmul.f32 1.0614054, %v1186_v31  ;;  %v1201_v11 = vmul.f32 %v348_v37, %v140_v7 }
  0x28   :  { %v263_v21 = vmul.f32 %v1141_v36, %v247_v10  ;;  %v255_v42 = vadd.f32 1.4214138, %v239_v22  ;;  %v976_v44 = vpop.eup %975  ;;  %v202_v50 = vmul.f32 1.0614054, %v1190_v38  ;;  %v1207_v2 = vmul.f32 1.442695, %v363_v62 }
  0x29   :  { %v264_v32 = vmul.f32 %v1146_v41, %v248_v15  ;;  %v256_v49 = vadd.f32 1.4214138, %v240_v33  ;;  %v217_v58 = vadd.f32 -1.4531521, %v201_v43  ;;  %v1196_v1 = vpop.eup %977  ;;  %vm442_vm6 = vcmp.ge.f32.partialorder %v1115_v60, 0.0 }
  0x2a   :  { %v279_v39 = vadd.f32 -0.28449672, %v263_v21  ;;  %v271_v56 = vmul.f32 %v1160_v54, %v255_v42  ;;  %v218_v10 = vadd.f32 -1.4531521, %v202_v50  ;;  %v1203_v12 = vpop.eup %979  ;;  %vm449_vm8 = vcmp.ge.f32.partialorder %v1126_v14, 0.0 }
  0x2b   :  { %v280_v46 = vadd.f32 -0.28449672, %v264_v32  ;;  %v272_v6 = vmul.f32 %v1166_v61, %v256_v49  ;;  %v233_v17 = vmul.f32 %v1186_v31, %v217_v58  ;;  %v1209_v21 = vpop.eup %981  ;;  %v209_v32 = vmul.f32 1.0614054, %v1203_v12 }
  0x2c   :  { %v295_v51 = vmul.f32 %v1141_v36, %v279_v39  ;;  %v287_v16 = vadd.f32 -0.28449672, %v271_v56  ;;  %v234_v29 = vmul.f32 %v1190_v38, %v218_v10  ;;  %v1213_v7 = vpop.eup %983  ;;  %v210_v39 = vmul.f32 1.0614054, %v1209_v21 }
  0x2d   :  { %v296_v5 = vmul.f32 %v1146_v41, %v280_v46  ;;  %v288_v28 = vadd.f32 -0.28449672, %v272_v6  ;;  %v249_v37 = vadd.f32 1.4214138, %v233_v17  ;;  %v1218_v42 = vpop.eup %985  ;;  %v225_v50 = vadd.f32 -1.4531521, %v209_v32 }
  0x2e   :  { %v311_v15 = vadd.f32 0.2548296, %v295_v51  ;;  %v303_v34 = vmul.f32 %v1160_v54, %v287_v16  ;;  %v250_v49 = vadd.f32 1.4214138, %v234_v29  ;;  %v1223_v51 = vpop.eup %987  ;;  %v226_v62 = vadd.f32 -1.4531521, %v210_v39 }
  0x2f   :  { %v312_v22 = vadd.f32 0.2548296, %v296_v5  ;;  %v304_v46 = vmul.f32 %v1166_v61, %v288_v28  ;;  %v265_v58 = vmul.f32 %v1186_v31, %v249_v37  ;;  %v241_v10 = vmul.f32 %v1203_v12, %v225_v50 }
  0x30   :  { %v327_v33 = vmul.f32 %v1141_v36, %v311_v15  ;;  %v319_v36 = vadd.f32 0.2548296, %v303_v34  ;;  %993 = vpow2.f32 %v1207_v2  ;;  %v385_v60 = vmul.f32 1.442695, %v1201_v11 }
  0x31   :  { %v328_v43 = vmul.f32 %v1146_v41, %v312_v22  ;;  %v320_v6 = vadd.f32 0.2548296, %v304_v46  ;;  %v266_v41 = vmul.f32 %v1190_v38, %v250_v49  ;;  %v281_v17 = vadd.f32 -0.28449672, %v265_v58 }
  0x32   :  { %v407_v56 = vmul.f32 %v1171_v4, %v327_v33  ;;  %v335_v16 = vmul.f32 %v1160_v54, %v319_v36  ;;  %v242_v4 = vmul.f32 %v1209_v21, %v226_v62  ;;  %v257_v32 = vadd.f32 1.4214138, %v241_v10  ;;  %v1236_v39 = vpop.eup %989 }
  0x33   :  { %v408_v5 = vmul.f32 %v1176_v9, %v328_v43  ;;  %v336_v28 = vmul.f32 %v1166_v61, %v320_v6  ;;  %v282_v29 = vadd.f32 -0.28449672, %v266_v41  ;;  %v297_v34 = vmul.f32 %v1186_v31, %v281_v17  ;;  %v1241_v50 = vpop.eup %991 }
  0x34   :  { %v423_v15 = vsub.f32 1.0, %v407_v56  ;;  %v415_v9 = vmul.f32 %v1182_v20, %v335_v16  ;;  %v258_v37 = vadd.f32 1.4214138, %v242_v4  ;;  %v273_v49 = vmul.f32 %v1203_v12, %v257_v32 }
  0x35   :  { %v424_v22 = vsub.f32 1.0, %v408_v5  ;;  %v416_v46 = vmul.f32 %v976_v44, %v336_v28  ;;  %v298_v54 = vmul.f32 %v1190_v38, %v282_v29  ;;  %v313_v20 = vadd.f32 0.2548296, %v297_v34 }
  0x36   :  { %v455_v33 = vsub.f32 0.0, %v423_v15  ;;  %v431_v56 = vsub.f32 1.0, %v415_v9  ;;  %v274_v36 = vmul.f32 %v1209_v21, %v258_v37  ;;  %v289_v16 = vadd.f32 -0.28449672, %v273_v49 }
  0x37   :  { %v456_v43 = vsub.f32 0.0, %v424_v22  ;;  %v432_v62 = vsub.f32 1.0, %v416_v46  ;;  %v314_v5 = vadd.f32 0.2548296, %v298_v54  ;;  %v329_v10 = vmul.f32 %v1186_v31, %v313_v20 }
  0x38   :  { %v471_v61 = vsel %vm439_vm0, %v423_v15, %v455_v33  ;;  %v463_v41 = vsub.f32 0.0, %v431_v56  ;;  %v290_v4 = vadd.f32 -0.28449672, %v274_v36  ;;  %v305_v29 = vmul.f32 %v1203_v12, %v289_v16 }
  0x39   :  { %v472_v44 = vsel %vm440_vm1, %v424_v22, %v456_v43  ;;  %v487_v58 = vadd.f32 1.0, %v471_v61  ;;  %v464_v15 = vsub.f32 0.0, %v432_v62  ;;  %v330_v17 = vmul.f32 %v1190_v38, %v314_v5 }
  0x3a   :  { %v488_v6 = vadd.f32 1.0, %v472_v44  ;;  %v479_v24 = vsel %vm447_vm2, %v431_v56, %v463_v41  ;;  %v409_v22 = vmul.f32 %v1196_v1, %v329_v10  ;;  %v321_v37 = vadd.f32 0.2548296, %v305_v29 }
  0x3b   :  { %v503_v23 = vmul.f32 %v487_v58, %v1106_v48  ;;  %v480_v31 = vsel %vm448_vm3, %v432_v62, %v464_v15  ;;  %v495_v33 = vadd.f32 1.0, %v479_v24  ;;  %v410_v48 = vmul.f32 %v1213_v7, %v330_v17 }
  0x3c   :  { %v504_v28 = vmul.f32 %v488_v6, %v1109_v52  ;;  %v496_v38 = vadd.f32 1.0, %v480_v31  ;;  %v425_v34 = vsub.f32 1.0, %v409_v22  ;;  %v306_v52 = vmul.f32 %v1209_v21, %v290_v4 }
  0x3d   :  { %v858_v32 = vpack.c.bf16 %v503_v23, %v503_v23  ;;  %v511_v25 = vmul.f32 %v495_v33, %v1111_v55  ;;  %v426_v1 = vsub.f32 1.0, %v410_v48  ;;  %v203_v26 = vmul.f32 1.0614054, %v1236_v39 }
  0x3e   :  { %v859_v9 = vpack.c.bf16 %v504_v28, %v504_v28  ;;  %v512_v7 = vmul.f32 %v496_v38, %v1118_v63  ;;  %v457_v43 = vsub.f32 0.0, %v425_v34  ;;  %v322_v46 = vadd.f32 0.2548296, %v306_v52 }
  0x3f   :  { %584 = vst.msk [vmem:[#allocation2] sm:$0xf] %vm583_vm4, %v858_v32  ;;  %v204_v54 = vmul.f32 1.0614054, %v1241_v50  ;;  %v866_v49 = vpack.c.bf16 %v511_v25, %v511_v25  ;;  %v458_v61 = vsub.f32 0.0, %v426_v1  ;;  %v337_v56 = vmul.f32 %v1203_v12, %v321_v37 }
  0x40   :  { %585 = vst.msk [vmem:[#allocation2 + $0x4] sm:$0xf] %vm583_vm4, %v859_v9  ;;  %v219_v20 = vadd.f32 -1.4531521, %v203_v26  ;;  %v867_v36 = vpack.c.bf16 %v512_v7, %v512_v7  ;;  %v473_v55 = vsel %vm441_vm5, %v425_v34, %v457_v43  ;;  %v338_v44 = vmul.f32 %v1209_v21, %v322_v46 }
  0x41   :  { %v220_v58 = vadd.f32 -1.4531521, %v204_v54  ;;  %592 = vst.msk [vmem:[#allocation2 + $0x20] sm:$0xf] %vm583_vm4, %v866_v49  ;;  %v474_v63 = vsel %vm442_vm6, %v426_v1, %v458_v61  ;;  %v489_v62 = vadd.f32 1.0, %v473_v55  ;;  %v417_v5 = vmul.f32 %v1218_v42, %v337_v56  ;;  %v908_v42 = vld [vmem:[%s1487_s0 + $0x18] sm:$0xff]   ;;  %v994_v56 = vpop.eup %993 }
  0x42   :  { %v235_v6 = vmul.f32 %v1236_v39, %v219_v20  ;;  %593 = vst.msk [vmem:[#allocation2 + $0x24] sm:$0xf] %vm583_vm4, %v867_v36  ;;  %v490_v12 = vadd.f32 1.0, %v474_v63  ;;  %v418_v41 = vmul.f32 %v1223_v51, %v338_v44  ;;  %vm450_vm9 = vcmp.ge.f32.partialorder %v1129_v19, 0.0 }
  0x43   :  { %v236_v59 = vmul.f32 %v1241_v50, %v220_v58  ;;  %v505_v21 = vmul.f32 %v489_v62, %v1120_v0  ;;  %v433_v10 = vsub.f32 1.0, %v417_v5  ;;  %995 = vpow2.f32 %v385_v60 }
  0x44   :  { %v251_v16 = vadd.f32 1.4214138, %v235_v6  ;;  %v506_v23 = vmul.f32 %v490_v12, %v1133_v27  ;;  %v434_v15 = vsub.f32 1.0, %v418_v41  ;;  %v77_v22 = vmul.f32 %v901_v13, %v1063_v3  ;;  %v912_v6 = vld [vmem:[%s1487_s0 + $0x38] sm:$0xff]  }
  0x45   :  { %v252_v51 = vadd.f32 1.4214138, %v236_v59  ;;  %v860_v4 = vpack.c.bf16 %v505_v21, %v505_v21  ;;  %v465_v28 = vsub.f32 0.0, %v433_v10  ;;  %v1299_v32 = vadd.f32 %v1074_v8, %v1180_v18 }
  0x46   :  { %v267_v2 = vmul.f32 %v1236_v39, %v251_v16  ;;  %v861_v0 = vpack.c.bf16 %v506_v23, %v506_v23  ;;  %v466_v24 = vsub.f32 0.0, %v434_v15  ;;  %v888_v31 = vunpack.c.l.bf16 %v908_v42 }
  0x47   :  { %v949_v17 = vld [vmem:[#allocation2] sm:$0xff]   ;;  %v268_v11 = vmul.f32 %v1241_v50, %v252_v51  ;;  %586 = vst.msk [vmem:[#allocation2 + $0x8] sm:$0xf] %vm583_vm4, %v860_v4  ;;  %v481_v27 = vsel %vm449_vm8, %v433_v10, %v465_v28  ;;  %v1305_v48 = vadd.f32 %v1074_v8, %v77_v22  ;;  %v1311_v52 = vmul.f32 0.70710677, %v1299_v32 }
  0x48   :  { %927 = vmatprep.mubr.msk.bf16.mxu0 %vm679_vm7, %v949_v17  ;;  %v283_v29 = vadd.f32 -0.28449672, %v267_v2  ;;  %587 = vst.msk [vmem:[#allocation2 + $0xc] sm:$0xf] %vm583_vm4, %v861_v0  ;;  %v482_v33 = vsel %vm450_vm9, %v434_v15, %v466_v24  ;;  %v497_v45 = vadd.f32 1.0, %v481_v27  ;;  %v889_v25 = vunpack.c.h.bf16 %v908_v42 }
  0x49   :  { %v284_v13 = vadd.f32 -0.28449672, %v268_v11  ;;  %v950_v9 = vld [vmem:[#allocation2 + $0x20] sm:$0xff]   ;;  %v498_v38 = vadd.f32 1.0, %v482_v33  ;;  %v1316_v37 = vmul.f32 0.70710677, %v1305_v48  ;;  %v70_v26 = vmul.f32 %v888_v31, %v1063_v3 }
  0x4a   :  { %v299_v14 = vmul.f32 %v1236_v39, %v283_v29  ;;  %v513_v34 = vmul.f32 %v497_v45, %v1136_v30  ;;  %935 = vmatprep.mubr.msk.bf16.mxu1 %vm679_vm7, %v950_v9  ;;  %v147_v30 = vand.u32 2147483647, %v1311_v52  ;;  %vm443_vm10 = vcmp.ge.f32.partialorder %v1158_v53, 0.0 }
  0x4b   :  { %v300_v18 = vmul.f32 %v1241_v50, %v284_v13  ;;  %v514_v19 = vmul.f32 %v498_v38, %v1155_v47  ;;  %v148_v49 = vand.u32 2147483647, %v1316_v37  ;;  %v71_v47 = vmul.f32 %v889_v25, %v1063_v3 }
  0x4c   :  { %v315_v1 = vadd.f32 0.2548296, %v299_v14  ;;  %v868_v7 = vpack.c.bf16 %v513_v34, %v513_v34  ;;  %v163_v61 = vmul.f32 0.3275911, %v147_v30  ;;  %v1327_v44 = vadd.f32 %v1074_v8, %v70_v26 }
  0x4d   :  { %v316_v43 = vadd.f32 0.2548296, %v300_v18  ;;  %v869_v46 = vpack.c.bf16 %v514_v19, %v514_v19  ;;  %v164_v55 = vmul.f32 0.3275911, %v148_v49  ;;  %v107_v21 = vmul.f32 0.5, %v1139_v35 }
  0x4e   :  { %v331_v54 = vmul.f32 %v1236_v39, %v315_v1  ;;  %594 = vst.msk [vmem:[#allocation2 + $0x28] sm:$0xf] %vm583_vm4, %v868_v7  ;;  %v179_v63 = vadd.f32 1.0, %v163_v61  ;;  %v1330_v39 = vadd.f32 %v1074_v8, %v71_v47  ;;  %v1334_v5 = vmul.f32 0.70710677, %v1327_v44 }
  0x4f   :  { %v951_v20 = vld [vmem:[#allocation2 + $0x8] sm:$0xff]   ;;  %595 = vst.msk [vmem:[#allocation2 + $0x2c] sm:$0xf] %vm583_vm4, %v869_v46  ;;  %v332_v36 = vmul.f32 %v1241_v50, %v316_v43  ;;  %v180_v62 = vadd.f32 1.0, %v164_v55  ;;  %v904_v60 = vunpack.c.l.bf16 %v912_v6  ;;  %v355_v23 = vsub.f32 0.0, %v147_v30 }
  0x50   :  { %v411_v58 = vmul.f32 %v994_v56, %v331_v54  ;;  %928 = vmatmul.mubr.msk.bf16.vlgmr.msra.gmra.mxu0 %vm679_vm7, %v951_v20  ;;  %v996_v50 = vpop.eup %995  ;;  %997 = vrcp.f32 %v179_v63  ;;  %v1341_v59 = vmul.f32 0.70710677, %v1330_v39  ;;  %v141_v16 = vand.u32 2147483647, %v1334_v5 }
  0x51   :  { %v412_v41 = vmul.f32 %v996_v50, %v332_v36  ;;  %999 = vrcp.f32 %v180_v62  ;;  %vm444_vm11 = vcmp.ge.f32.partialorder %v1163_v57, 0.0  ;;  %v905_v53 = vunpack.c.h.bf16 %v912_v6 }
  0x52   :  { %v427_v12 = vsub.f32 1.0, %v411_v58  ;;  %v142_v15 = vand.u32 2147483647, %v1341_v59  ;;  %v157_v4 = vmul.f32 0.3275911, %v141_v16  ;;  %v356_v0 = vsub.f32 0.0, %v148_v49 }
  0x53   :  { %v428_v42 = vsub.f32 1.0, %v412_v41  ;;  %v108_v35 = vmul.f32 0.5, %v1144_v40  ;;  %v78_v22 = vmul.f32 %v904_v60, %v1063_v3  ;;  %v79_v27 = vmul.f32 %v905_v53, %v1063_v3 }
  0x54   :  { %v459_v10 = vsub.f32 0.0, %v427_v12  ;;  %v158_v24 = vmul.f32 0.3275911, %v142_v15  ;;  %v173_v11 = vadd.f32 1.0, %v157_v4  ;;  %v371_v33 = vmul.f32 %v355_v23, %v147_v30 }
  0x55   :  { %v460_v28 = vsub.f32 0.0, %v428_v42  ;;  %v1352_v13 = vadd.f32 %v1074_v8, %v78_v22  ;;  %v372_v38 = vmul.f32 %v356_v0, %v148_v49  ;;  %v1355_v14 = vadd.f32 %v1074_v8, %v79_v27 }
  0x56   :  { %v952_v51 = vld [vmem:[#allocation2 + $0x28] sm:$0xff]   ;;  %v475_v17 = vsel %vm443_vm10, %v427_v12, %v459_v10  ;;  %v174_v57 = vadd.f32 1.0, %v158_v24  ;;  %1001 = vrcp.f32 %v173_v11  ;;  %v399_v3 = vmul.f32 1.442695, %v371_v33 }
  0x57   :  { %v491_v2 = vadd.f32 1.0, %v475_v17  ;;  %936 = vmatmul.mubr.msk.bf16.vlgmr.msra.gmra.mxu1 %vm679_vm7, %v952_v51  ;;  %v476_v29 = vsel %vm444_vm11, %v428_v42, %v460_v28  ;;  %v1358_v34 = vmul.f32 0.70710677, %v1352_v13  ;;  %v1362_v18 = vmul.f32 0.70710677, %v1355_v14 }
  0x58   :  { %v492_v45 = vadd.f32 1.0, %v476_v29  ;;  %1003 = vrcp.f32 %v174_v57  ;;  %v349_v19 = vsub.f32 0.0, %v141_v16  ;;  %v350_v1 = vsub.f32 0.0, %v142_v15 }
  0x59   :  { %v507_v31 = vmul.f32 %v491_v2, %v107_v21  ;;  %v149_v26 = vand.u32 2147483647, %v1358_v34  ;;  %v401_v43 = vmul.f32 1.442695, %v372_v38  ;;  %v150_v8 = vand.u32 2147483647, %v1362_v18 }
  0x5a   :  { %v508_v40 = vmul.f32 %v492_v45, %v108_v35  ;;  %1005 = vpow2.f32 %v399_v3  ;;  %v365_v56 = vmul.f32 %v349_v19, %v141_v16  ;;  %v366_v20 = vmul.f32 %v350_v1, %v142_v15 }
  0x5b   :  { %v862_v9 = vpack.c.bf16 %v507_v31, %v507_v31  ;;  %v165_v54 = vmul.f32 0.3275911, %v149_v26  ;;  %v166_v61 = vmul.f32 0.3275911, %v150_v8  ;;  %1007 = vpow2.f32 %v401_v43 }
  0x5c   :  { %v863_v25 = vpack.c.bf16 %v508_v40, %v508_v40  ;;  %v387_v50 = vmul.f32 1.442695, %v365_v56  ;;  %v389_v12 = vmul.f32 1.442695, %v366_v20  ;;  %v357_v23 = vsub.f32 0.0, %v149_v26 }
  0x5d   :  { %588 = vst.msk [vmem:[#allocation2 + $0x10] sm:$0xf] %vm583_vm4, %v862_v9  ;;  %v998_v7 = vpop.eup %997  ;;  %v181_v36 = vadd.f32 1.0, %v165_v54  ;;  %v182_v58 = vadd.f32 1.0, %v166_v61  ;;  %v358_v17 = vsub.f32 0.0, %v150_v8  ;;  %vm451_vm12 = vcmp.ge.f32.partialorder %v1311_v52, 0.0 }
  0x5e   :  { %v1000_v30 = vpop.eup %999  ;;  %589 = vst.msk [vmem:[#allocation2 + $0x14] sm:$0xf] %vm583_vm4, %v863_v25  ;;  %v211_v46 = vmul.f32 1.0614054, %v998_v7  ;;  %v373_v35 = vmul.f32 %v357_v23, %v149_v26  ;;  %vm452_vm13 = vcmp.ge.f32.partialorder %v1316_v37, 0.0  ;;  %vm445_vm14 = vcmp.ge.f32.partialorder %v1334_v5, 0.0 }
  0x5f   :  { %v212_v49 = vmul.f32 1.0614054, %v1000_v30  ;;  %1009 = vrcp.f32 %v181_v36  ;;  %v374_v27 = vmul.f32 %v358_v17, %v150_v8  ;;  %vm446_vm15 = vcmp.ge.f32.partialorder %v1341_v59, 0.0 }
  0x60   :  { %v227_v47 = vadd.f32 -1.4531521, %v211_v46  ;;  %1011 = vrcp.f32 %v182_v58  ;;  %v403_v3 = vmul.f32 1.442695, %v373_v35  ;;  %vm453_vm0 = vcmp.ge.f32.partialorder %v1358_v34, 0.0 }
  0x61   :  { %v228_v55 = vadd.f32 -1.4531521, %v212_v49  ;;  %1013 = vpow2.f32 %v387_v50  ;;  %v405_v26 = vmul.f32 1.442695, %v374_v27  ;;  %v115_v50 = vmul.f32 0.5, %v1299_v32 }
  0x62   :  { %v243_v63 = vmul.f32 %v998_v7, %v227_v47  ;;  %1015 = vpow2.f32 %v389_v12  ;;  %vm454_vm1 = vcmp.ge.f32.partialorder %v1362_v18, 0.0 }
  0x63   :  { %v244_v62 = vmul.f32 %v1000_v30, %v228_v55  ;;  %v1367_v41 = vpop.eup %1001  ;;  %1017 = vpow2.f32 %v403_v3 }
  0x64   :  { %v259_v6 = vadd.f32 1.4214138, %v243_v63  ;;  %v205_v16 = vmul.f32 1.0614054, %v1367_v41  ;;  %1019 = vpow2.f32 %v405_v26 }
  0x65   :  { %v953_v21 = vld [vmem:[#allocation2 + $0x10] sm:$0xff]   ;;  %v260_v10 = vadd.f32 1.4214138, %v244_v62  ;;  %v1369_v60 = vpop.eup %1003 }
  0x66   :  { %v275_v42 = vmul.f32 %v998_v7, %v259_v6  ;;  %931 = vmatprep.mubr.msk.bf16.mxu0 %vm679_vm7, %v953_v21  ;;  %v206_v51 = vmul.f32 1.0614054, %v1369_v60  ;;  %v221_v53 = vadd.f32 -1.4531521, %v205_v16  ;;  %v116_v16 = vmul.f32 0.5, %v1305_v48 }
  0x67   :  { %v276_v15 = vmul.f32 %v1000_v30, %v260_v10  ;;  %v1006_v29 = vpop.eup %1005 }
  0x68   :  { %v291_v4 = vadd.f32 -0.28449672, %v275_v42  ;;  %v222_v2 = vadd.f32 -1.4531521, %v206_v51  ;;  %v237_v24 = vmul.f32 %v1367_v41, %v221_v53  ;;  %v1008_v9 = vpop.eup %1007 }
  0x69   :  { %v292_v28 = vadd.f32 -0.28449672, %v276_v15 }
  0x6a   :  { %v307_v0 = vmul.f32 %v998_v7, %v291_v4  ;;  %v238_v22 = vmul.f32 %v1369_v60, %v222_v2  ;;  %v253_v33 = vadd.f32 1.4214138, %v237_v24 }
  0x6b   :  { %v308_v11 = vmul.f32 %v1000_v30, %v292_v28 }
  0x6c   :  { %v323_v31 = vadd.f32 0.2548296, %v307_v0  ;;  %v254_v45 = vadd.f32 1.4214138, %v238_v22  ;;  %v269_v40 = vmul.f32 %v1367_v41, %v253_v33  ;;  %v1377_v25 = vpop.eup %1009  ;;  %v109_v33 = vmul.f32 0.5, %v1327_v44 }
  0x6d   :  { %v324_v57 = vadd.f32 0.2548296, %v308_v11  ;;  %v1380_v43 = vpop.eup %1011  ;;  %v213_v54 = vmul.f32 1.0614054, %v1377_v25 }
  0x6e   :  { %v339_v38 = vmul.f32 %v998_v7, %v323_v31  ;;  %v270_v1 = vmul.f32 %v1369_v60, %v254_v45  ;;  %v285_v8 = vadd.f32 -0.28449672, %v269_v40  ;;  %v214_v7 = vmul.f32 1.0614054, %v1380_v43  ;;  %v1014_v6 = vpop.eup %1013 }
  0x6f   :  { %v340_v19 = vmul.f32 %v1000_v30, %v324_v57  ;;  %v229_v20 = vadd.f32 -1.4531521, %v213_v54  ;;  %v1016_v42 = vpop.eup %1015 }
  0x70   :  { %v419_v46 = vmul.f32 %v1006_v29, %v339_v38  ;;  %v286_v61 = vadd.f32 -0.28449672, %v270_v1  ;;  %v301_v56 = vmul.f32 %v1367_v41, %v285_v8  ;;  %v230_v55 = vadd.f32 -1.4531521, %v214_v7  ;;  %v1018_v40 = vpop.eup %1017 }
  0x71   :  { %v420_v49 = vmul.f32 %v1008_v9, %v340_v19  ;;  %v245_v62 = vmul.f32 %v1377_v25, %v229_v20  ;;  %v110_v9 = vmul.f32 0.5, %v1330_v39  ;;  %v1020_v1 = vpop.eup %1019 }
  0x72   :  { %v435_v47 = vsub.f32 1.0, %v419_v46  ;;  %v302_v36 = vmul.f32 %v1369_v60, %v286_v61  ;;  %v317_v63 = vadd.f32 0.2548296, %v301_v56  ;;  %v246_v10 = vmul.f32 %v1380_v43, %v230_v55 }
  0x73   :  { %v436_v30 = vsub.f32 1.0, %v420_v49  ;;  %v261_v37 = vadd.f32 1.4214138, %v245_v62 }
  0x74   :  { %v467_v58 = vsub.f32 0.0, %v435_v47  ;;  %v318_v21 = vadd.f32 0.2548296, %v302_v36  ;;  %v333_v15 = vmul.f32 %v1367_v41, %v317_v63  ;;  %v262_v53 = vadd.f32 1.4214138, %v246_v10 }
  0x75   :  { %v468_v12 = vsub.f32 0.0, %v436_v30  ;;  %v277_v2 = vmul.f32 %v1377_v25, %v261_v37  ;;  %v118_v36 = vmul.f32 0.5, %v1355_v14 }
  0x76   :  { %v483_v23 = vsel %vm451_vm12, %v435_v47, %v467_v58  ;;  %v334_v4 = vmul.f32 %v1369_v60, %v318_v21  ;;  %v413_v32 = vmul.f32 %v1014_v6, %v333_v15  ;;  %v278_v35 = vmul.f32 %v1380_v43, %v262_v53 }
  0x77   :  { %v484_v51 = vsel %vm452_vm13, %v436_v30, %v468_v12  ;;  %v499_v17 = vadd.f32 1.0, %v483_v23  ;;  %v293_v52 = vadd.f32 -0.28449672, %v277_v2 }
  0x78   :  { %v500_v28 = vadd.f32 1.0, %v484_v51  ;;  %v414_v24 = vmul.f32 %v1016_v42, %v334_v4  ;;  %v429_v11 = vsub.f32 1.0, %v413_v32  ;;  %v294_v41 = vadd.f32 -0.28449672, %v278_v35 }
  0x79   :  { %v515_v0 = vmul.f32 %v499_v17, %v115_v50  ;;  %v309_v31 = vmul.f32 %v1377_v25, %v293_v52 }
  0x7a   :  { %v516_v48 = vmul.f32 %v500_v28, %v116_v16  ;;  %v430_v27 = vsub.f32 1.0, %v414_v24  ;;  %v461_v60 = vsub.f32 0.0, %v429_v11  ;;  %v310_v45 = vmul.f32 %v1380_v43, %v294_v41 }
  0x7b   :  { %v870_v22 = vpack.c.bf16 %v515_v0, %v515_v0  ;;  %v325_v5 = vadd.f32 0.2548296, %v309_v31 }
  0x7c   :  { %v871_v29 = vpack.c.bf16 %v516_v48, %v516_v48  ;;  %v462_v57 = vsub.f32 0.0, %v430_v27  ;;  %v477_v38 = vsel %vm445_vm14, %v429_v11, %v461_v60  ;;  %v326_v59 = vadd.f32 0.2548296, %v310_v45 }
  0x7d   :  { %596 = vst.msk [vmem:[#allocation2 + $0x30] sm:$0xf] %vm583_vm4, %v870_v22  ;;  %v493_v19 = vadd.f32 1.0, %v477_v38  ;;  %v341_v46 = vmul.f32 %v1377_v25, %v325_v5 }
  0x7e   :  { %597 = vst.msk [vmem:[#allocation2 + $0x34] sm:$0xf] %vm583_vm4, %v871_v29  ;;  %v478_v3 = vsel %vm446_vm15, %v430_v27, %v462_v57  ;;  %v342_v44 = vmul.f32 %v1380_v43, %v326_v59  ;;  %v117_v43 = vmul.f32 0.5, %v1352_v13  ;;  %v839_v13 = vld [vmem:[%s1490_s4] ss:$0 sm:$0xff] }
  0x7f   :  { %v494_v26 = vadd.f32 1.0, %v478_v3  ;;  %v509_v8 = vmul.f32 %v493_v19, %v109_v33  ;;  %v421_v49 = vmul.f32 %v1018_v40, %v341_v46 }
  0x80   :  { %v422_v7 = vmul.f32 %v1020_v1, %v342_v44 }
  0x81   :  { %v510_v54 = vmul.f32 %v494_v26, %v110_v9  ;;  %v864_v61 = vpack.c.bf16 %v509_v8, %v509_v8  ;;  %v437_v56 = vsub.f32 1.0, %v421_v49 }
  0x82   :  { %v438_v20 = vsub.f32 1.0, %v422_v7 }
  0x83   :  { %v865_v47 = vpack.c.bf16 %v510_v54, %v510_v54  ;;  %590 = vst.msk [vmem:[#allocation2 + $0x18] sm:$0xf] %vm583_vm4, %v864_v61  ;;  %v469_v25 = vsub.f32 0.0, %v437_v56 }
  0x84   :  { %v470_v30 = vsub.f32 0.0, %v438_v20 }
  0x85   :  { %v954_v39 = vld [vmem:[#allocation2 + $0x30] sm:$0xff]   ;;  %591 = vst.msk [vmem:[#allocation2 + $0x1c] sm:$0xf] %vm583_vm4, %v865_v47  ;;  %v485_v55 = vsel %vm453_vm0, %v437_v56, %v469_v25 }
  0x86   :  { %939 = vmatprep.mubr.msk.bf16.mxu1 %vm679_vm7, %v954_v39  ;;  %v486_v58 = vsel %vm454_vm1, %v438_v20, %v470_v30  ;;  %v501_v63 = vadd.f32 1.0, %v485_v55 }
  0x87   :  { %v502_v62 = vadd.f32 1.0, %v486_v58 }
  0x88   :  { %v517_v6 = vmul.f32 %v501_v63, %v117_v43 }
  0x89   :  { %v518_v50 = vmul.f32 %v502_v62, %v118_v36 }
  0x8a   :  { %v872_v34 = vpack.c.bf16 %v517_v6, %v517_v6 }
  0x8b   :  { %v873_v21 = vpack.c.bf16 %v518_v50, %v518_v50 }
  0x8c   :  { %v955_v12 = vld [vmem:[#allocation2 + $0x18] sm:$0xff]   ;;  %598 = vst.msk [vmem:[#allocation2 + $0x38] sm:$0xf] %vm583_vm4, %v872_v34 }
  0x8d   :  { %932 = vmatmul.mubr.msk.bf16.gmra.mxu0 %vm679_vm7, %v955_v12  ;;  %599 = vst.msk [vmem:[#allocation2 + $0x3c] sm:$0xf] %vm583_vm4, %v873_v21 }
  0x94   :  { %v956_v18 = vld [vmem:[#allocation2 + $0x38] sm:$0xff]  }
  0x95   :  { %940 = vmatmul.mubr.msk.bf16.gmra.mxu1 %vm679_vm7, %v956_v18 }
 0x110   :  { %v929_v14 = vpop.f32.mrf.mxu0 }
 0x111   :  { %v747_v10 = vadd.f32 %v929_v14, %v839_v13 }
 0x112   :  { %v738_v42 = vpop.f32.mrf.mxu0 }
 0x113   :  { %803 = vst.msk [vmem:[%s1491_s5 + $0x10] sm:$0xff] %vm679_vm7, %v747_v10  ;;  %v739_v16 = vadd.f32 %v839_v13, %v738_v42 }
 0x114   :  { %v930_v23 = vpop.f32.mrf.mxu0 }
 0x115   :  { %801 = vst.msk [vmem:[%s1491_s5] sm:$0xff] %vm679_vm7, %v739_v16  ;;  %v750_v15 = vadd.f32 %v930_v23, %v839_v13 }
 0x116   :  { %v741_v37 = vpop.f32.mrf.mxu0 }
 0x117   :  { %v937_v51 = vpop.f32.mrf.mxu1  ;;  %804 = vst.msk [vmem:[%s1491_s5 + $0x18] sm:$0xff] %vm679_vm7, %v750_v15  ;;  %v742_v17 = vadd.f32 %v839_v13, %v741_v37 }
 0x118   :  { %v779_v4 = vadd.f32 %v937_v51, %v839_v13 }
 0x119   :  { %v770_v53 = vpop.f32.mrf.mxu1  ;;  %802 = vst.msk [vmem:[%s1491_s5 + $0x8] sm:$0xff] %vm679_vm7, %v742_v17 }
 0x11a   :  { %811 = vst.msk [vmem:[%s1491_s5 + $0x50] sm:$0xff] %vm679_vm7, %v779_v4  ;;  %v771_v28 = vadd.f32 %v839_v13, %v770_v53 }
 0x11b   :  { %v938_v32 = vpop.f32.mrf.mxu1 }
 0x11c   :  { %809 = vst.msk [vmem:[%s1491_s5 + $0x40] sm:$0xff] %vm679_vm7, %v771_v28  ;;  %v782_v2 = vadd.f32 %v938_v32, %v839_v13 }
 0x11d   :  { %v773_v0 = vpop.f32.mrf.mxu1 }
 0x11e   :  { %812 = vst.msk [vmem:[%s1491_s5 + $0x58] sm:$0xff] %vm679_vm7, %v782_v2  ;;  %v774_v24 = vadd.f32 %v839_v13, %v773_v0 }
 0x120   :  { %810 = vst.msk [vmem:[%s1491_s5 + $0x48] sm:$0xff] %vm679_vm7, %v774_v24 }
 0x14d   :  { %v933_v35 = vpop.f32.mrf.mxu0 }
 0x14e   :  { %v763_v48 = vadd.f32 %v933_v35, %v839_v13 }
 0x14f   :  { %v754_v11 = vpop.f32.mrf.mxu0 }
 0x150   :  { %807 = vst.msk [vmem:[%s1491_s5 + $0x30] sm:$0xff] %vm679_vm7, %v763_v48  ;;  %v755_v52 = vadd.f32 %v839_v13, %v754_v11 }
 0x151   :  { %v934_v22 = vpop.f32.mrf.mxu0 }
 0x152   :  { %805 = vst.msk [vmem:[%s1491_s5 + $0x20] sm:$0xff] %vm679_vm7, %v755_v52  ;;  %v766_v27 = vadd.f32 %v934_v22, %v839_v13 }
 0x153   :  { %v757_v41 = vpop.f32.mrf.mxu0 }
 0x154   :  { %808 = vst.msk [vmem:[%s1491_s5 + $0x38] sm:$0xff] %vm679_vm7, %v766_v27  ;;  %v758_v29 = vadd.f32 %v839_v13, %v757_v41 }
 0x155   :  { %v941_v60 = vpop.f32.mrf.mxu1 }
 0x156   :  { %806 = vst.msk [vmem:[%s1491_s5 + $0x28] sm:$0xff] %vm679_vm7, %v758_v29  ;;  %v795_v31 = vadd.f32 %v941_v60, %v839_v13 }
 0x157   :  { %v786_v33 = vpop.f32.mrf.mxu1 }
 0x158   :  { %815 = vst.msk [vmem:[%s1491_s5 + $0x70] sm:$0xff] %vm679_vm7, %v795_v31  ;;  %v787_v57 = vadd.f32 %v839_v13, %v786_v33 }
 0x159   :  { %v942_v45 = vpop.f32.mrf.mxu1 }
 0x15a   :  { %813 = vst.msk [vmem:[%s1491_s5 + $0x60] sm:$0xff] %vm679_vm7, %v787_v57  ;;  %v798_v9 = vadd.f32 %v942_v45, %v839_v13 }
 0x15b   :  { %v789_v38 = vpop.f32.mrf.mxu1 }
 0x15c   :  { %816 = vst.msk [vmem:[%s1491_s5 + $0x78] sm:$0xff] %vm679_vm7, %v798_v9  ;;  %v790_v5 = vadd.f32 %v839_v13, %v789_v38 }
 0x15e   :  { %814 = vst.msk [vmem:[%s1491_s5 + $0x68] sm:$0xff] %vm679_vm7, %v790_v5 }

</bundles_post_ra>
